<compile_context>
chip_gen: v7x
topology: tpu7x:2x2x1
jax: 0.10.0
libtpu: 0.0.40
codegen_flags: <defaults>
</compile_context>

<pallas_src>
import math
from functools import partial

import jax
import jax.numpy as jnp
from jax.experimental import pallas as pl
from jax.experimental.pallas import tpu as pltpu


def _mha_kernel(x_ref, w_ref, b_ref, wo_ref, bo_ref,
                out_ref, attn_ref,
                q_sc, k_sc, v_sc, ctx_sc,
                *, n_heads, head_dim, hidden, head_block, num_head_blocks,
                fused, exp_bf16):
    """Grid step = (batch block, head block).

    head block 0      : QKV projection for all rows of the batch block,
                        cast to bf16 once, parked in per-head VMEM slabs.
    every head block  : attention for `head_block` heads -> attn tile + ctx slab.
    last head block   : single fused Wo 1x1-conv over the full ctx slab -> out.
    """
    bt = out_ref.shape[0]
    hb = head_block
    hblk = pl.program_id(1)

    # ---- head-block 0: QKV projection (once per batch block) ----------------
    @pl.when(hblk == 0)
    def _project():
        for bi in range(bt):
            if fused:
                # ONE MXU pass over the block-diagonal (3*hidden, 3*C_in) weight.
                qkv = (jnp.dot(w_ref[...], x_ref[bi],
                               preferred_element_type=jnp.float32) + b_ref[...])
                parts = (qkv[0:hidden, :],
                         qkv[hidden:2 * hidden, :],
                         qkv[2 * hidden:3 * hidden, :])
            else:
                # Large-C_in fallback: three separate projections (no 2/3-zero
                # contraction on the MXU).
                parts = tuple(
                    jnp.dot(w_ref[j], x_ref[bi, j],
                            preferred_element_type=jnp.float32) + b_ref[j]
                    for j in range(3))
            for dst, part in zip((q_sc, k_sc, v_sc), parts):
                if head_dim % 16 == 0:
                    # bf16 cast hoisted: one cast, tile-aligned (16-row) slices.
                    part_b = part.astype(jnp.bfloat16)
                    for h0 in range(n_heads):
                        dst[bi * n_heads + h0] = (
                            part_b[h0 * head_dim:(h0 + 1) * head_dim, :])
                else:
                    # head_dim not a multiple of the bf16 sublane packing: slice
                    # the f32 value (aligned) and cast per head to avoid repack.
                    for h0 in range(n_heads):
                        dst[bi * n_heads + h0] = (
                            part[h0 * head_dim:(h0 + 1) * head_dim, :]
                            .astype(jnp.bfloat16))

    # ---- attention for this head block ---------------------------------------
    for bi in range(bt):
        for hj in range(hb):
            if num_head_blocks == 1:
                h = hj                                   # fully static indexing
            else:
                h = hblk * hb + hj                       # dynamic head index
            slab = bi * n_heads + h
            qh = q_sc[slab]                              # (head_dim, L) bf16, pre-scaled
            kh = k_sc[slab]
            vh = v_sc[slab]

            # energy[q, k] = sum_d qh[d, q] * kh[d, k]; 1/sqrt(d) folded into Wq.
            energy = jax.lax.dot_general(
                qh, kh, (((0,), (0,)), ((), ())),
                preferred_element_type=jnp.float32)      # (L, L) f32

            e_max = jnp.max(energy, axis=-1, keepdims=True)
            shifted = energy - e_max
            if exp_bf16:
                p = jnp.exp(shifted.astype(jnp.bfloat16))   # bf16 EUP (v6e/v7x)
            else:
                p = jnp.exp(shifted)                        # f32 EUP (<= v5)
            denom = jnp.sum(p.astype(jnp.float32), axis=-1, keepdims=True)
            # Exact reciprocal so the *returned* attention rows sum to 1.
            attn = p.astype(jnp.float32) * pl.reciprocal(denom, approx=False)
            attn_ref[bi, hj] = attn.astype(attn_ref.dtype)

            # TODO(synk): training-mode attention dropout (pltpu.prng_*) not
            # implemented; eval mode => identity, matching forward semantics.

            # ctx[d, q] = sum_k vh[d, k] * attn[q, k]
            ctx = jax.lax.dot_general(
                vh, attn.astype(jnp.bfloat16), (((1,), (1,)), ((), ())),
                preferred_element_type=jnp.float32)      # (head_dim, L) f32

            if num_head_blocks == 1:
                lo = bi * hidden + hj * head_dim         # static offset
                ctx_sc[lo:lo + head_dim, :] = ctx
            else:
                lo = pl.multiple_of(bi * hidden + h * head_dim, 8)
                ctx_sc[pl.ds(lo, head_dim), :] = ctx

    # ---- last head block: fused output 1x1 conv ------------------------------
    @pl.when(hblk == num_head_blocks - 1)
    def _finalize():
        for bi in range(bt):
            ctx_full = ctx_sc[bi * hidden:(bi + 1) * hidden, :].astype(jnp.bfloat16)
            out_ref[bi] = (jnp.dot(wo_ref[...], ctx_full,
                                   preferred_element_type=jnp.float32)
                           + bo_ref[...]).astype(out_ref.dtype)


def _padded_bytes(shape, dtype):
    """Approximate VMEM footprint: minor dim padded to 128 lanes, second-minor
    padded to the dtype's sublane tile (8 for 32-bit, 16 for bf16)."""
    itemsize = jnp.dtype(dtype).itemsize
    dims = list(shape)
    if len(dims) >= 1:
        dims[-1] = -(-dims[-1] // 128) * 128
    if len(dims) >= 2:
        sub = 8 * max(1, 4 // itemsize)
        dims[-2] = -(-dims[-2] // sub) * sub
    n = 1
    for d in dims:
        n *= int(d)
    return n * itemsize


def multi_head_attention(query, key, value, params, n_heads, *,
                         batch_block=None, head_block=None,
                         attn_dtype=jnp.float32, fuse_qkv=None):
    """query/key/value: (B, in_c, L) float32, PyTorch NCW layout kept end-to-end
    (L stays on the lane axis; no wrapper transposes).

    Returns (out, attention) matching MultiHeadAttnetionLayer.forward (eval mode).
    `attn_dtype=jnp.bfloat16` halves the (B, H, L, L) HBM writeback when exact
    f32 probabilities are not required downstream.
    """
    wq, bq, wk, bk, wv, bv, wo, bo = params        # channel-major (out, in) / (out, 1)
    B, C_in, L = query.shape
    hidden = wq.shape[0]
    assert hidden % n_heads == 0
    head_dim = hidden // n_heads
    inv_scale = 1.0 / math.sqrt(head_dim)

    # ---- per-generation hardware queries -------------------------------------
    try:
        vmem_cap = int(pltpu.get_tpu_info().vmem_capacity_bytes)  # 64 MiB/TC v7x, 128 MiB v5e/v6e
    except Exception:
        vmem_cap = 64 * 2 ** 20                                    # conservative fallback
    vmem_budget = max(16 * 2 ** 20, (vmem_cap * 3) // 4)           # leave headroom

    try:
        kind = jax.devices()[0].device_kind.lower()
        old_gen = any(t in kind for t in ("v2", "v3", "v4", "v5"))
    except Exception:
        old_gen = True
    exp_bf16 = not old_gen                    # bf16 EUP exp only on v6e/v7x-class parts
    mxu_depth = 128 if old_gen else 256       # MXU contraction tile depth

    # ---- projection fusion gate -----------------------------------------------
    # Block-diagonal QKV triples the contraction dim with 2/3 zeros; only free
    # while 3*C_in fits one MXU contraction tile on this generation.
    if fuse_qkv is None:
        fuse_qkv = (3 * C_in) <= mxu_depth

    # ---- parameter packing (trace-time, tiny) ---------------------------------
    # Fold 1/sqrt(head_dim) into the Q projection, cast weights to bf16.
    if fuse_qkv:
        w_pack = jnp.zeros((3 * hidden, 3 * C_in), jnp.float32)
        w_pack = w_pack.at[:hidden, :C_in].set(wq * inv_scale)
        w_pack = w_pack.at[hidden:2 * hidden, C_in:2 * C_in].set(wk)
        w_pack = w_pack.at[2 * hidden:, 2 * C_in:].set(wv)
        w_pack = w_pack.astype(jnp.bfloat16)
        b_pack = jnp.concatenate([bq * inv_scale, bk, bv], axis=0).astype(jnp.float32)
        x_pack = jnp.concatenate([query, key, value], axis=1).astype(jnp.bfloat16)
    else:
        w_pack = jnp.stack([wq * inv_scale, wk, wv], axis=0).astype(jnp.bfloat16)
        b_pack = jnp.stack([bq * inv_scale, bk, bv], axis=0).astype(jnp.float32)
        x_pack = jnp.stack([query, key, value], axis=1).astype(jnp.bfloat16)
    wo_b = wo.astype(jnp.bfloat16)
    bo_f = bo.astype(jnp.float32)

    # ---- tiling heuristic ------------------------------------------------------
    # Realistic shapes: batch on the grid (bt=1) and heads on the grid (hb=1) ->
    # small resident blocks, per-head attn writeback pipelining, work for a
    # second TensorCore.  Tiny problems collapse to a single grid step (grid
    # overhead ~0.35us/step would dominate sub-microsecond compute).
    per_row_flops = (2 * 3 * hidden * 3 * C_in * L        # QKV projection
                     + n_heads * 4 * L * L * head_dim     # QK^T + AV
                     + 2 * C_in * hidden * L)             # output projection
    tiny = B * per_row_flops < 4_000_000

    if batch_block is None:
        batch_block = B if tiny else 1
    batch_block = max(1, min(int(batch_block), B))
    while B % batch_block:
        batch_block -= 1

    if head_block is None:
        head_block = n_heads if (tiny or head_dim % 8) else 1
    head_block = max(1, min(int(head_block), n_heads))
    while n_heads % head_block:
        head_block -= 1
    if head_block != n_heads and head_dim % 8:
        head_block = n_heads          # dynamic head slabs require 8-row alignment

    def vmem_need(bt, hb):
        if fuse_qkv:
            in_blk = _padded_bytes((bt, 3 * C_in, L), jnp.bfloat16)
            w_byt = (_padded_bytes((3 * hidden, 3 * C_in), jnp.bfloat16)
                     + _padded_bytes((3 * hidden, 1), jnp.float32))
        else:
            in_blk = _padded_bytes((bt, 3, C_in, L), jnp.bfloat16)
            w_byt = (_padded_bytes((3, hidden, C_in), jnp.bfloat16)
                     + _padded_bytes((3, hidden, 1), jnp.float32))
        w_byt += (_padded_bytes((C_in, hidden), jnp.bfloat16)
                  + _padded_bytes((C_in, 1), jnp.float32))
        out_blk = _padded_bytes((bt, C_in, L), jnp.float32)
        attn_blk = _padded_bytes((bt, hb, L, L), attn_dtype)
        scratch = (3 * bt * n_heads * _padded_bytes((head_dim, L), jnp.bfloat16)
                   + _padded_bytes((bt * hidden, L), jnp.float32))
        work = bt * (_padded_bytes((3 * hidden, L), jnp.float32)
                     + 4 * _padded_bytes((L, L), jnp.float32)
                     + _padded_bytes((hidden, L), jnp.float32))
        # inputs/outputs are double-buffered by the BlockSpec pipeline
        return 2 * (in_blk + out_blk + attn_blk) + 2 * w_byt + scratch + work + (2 << 20)

    # shrink tiles until the (padded) request fits the per-generation budget
    while vmem_need(batch_block, head_block) > vmem_budget and batch_block > 1:
        batch_block -= 1
        while B % batch_block:
            batch_block -= 1
    while (vmem_need(batch_block, head_block) > vmem_budget and head_block > 1
           and head_dim % 8 == 0):
        head_block -= 1
        while n_heads % head_block:
            head_block -= 1

    bt, hb = batch_block, head_block
    num_head_blocks = n_heads // hb
    grid = (B // bt, num_head_blocks)
    vmem_limit = int(min(vmem_budget, max(4 * vmem_need(bt, hb), 32 * 2 ** 20)))

    kernel = partial(_mha_kernel, n_heads=n_heads, head_dim=head_dim, hidden=hidden,
                     head_block=hb, num_head_blocks=num_head_blocks,
                     fused=fuse_qkv, exp_bf16=exp_bf16)

    def _const_spec(arr):
        nd = arr.ndim

        def index_map(b, h):
            return (0,) * nd

        return pl.BlockSpec(arr.shape, index_map)

    if fuse_qkv:
        x_spec = pl.BlockSpec((bt, 3 * C_in, L), lambda b, h: (b, 0, 0))
    else:
        x_spec = pl.BlockSpec((bt, 3, C_in, L), lambda b, h: (b, 0, 0, 0))

    # NOTE: with ample VMEM headroom on v5e/v6e, pipeline_mode=pl.Buffered(3) on
    # the x / attn specs would deepen the pipeline; omitted here for simplicity.
    out, attn = pl.pallas_call(
        kernel,
        out_shape=(
            jax.ShapeDtypeStruct((B, C_in, L), jnp.float32),
            jax.ShapeDtypeStruct((B, n_heads, L, L), attn_dtype),
        ),
        grid=grid,
        in_specs=[x_spec, _const_spec(w_pack), _const_spec(b_pack),
                  _const_spec(wo_b), _const_spec(bo_f)],
        out_specs=(
            # out block is revisited across the head axis and written only at the
            # last head block (accumulator pattern) -> head axis is "arbitrary".
            pl.BlockSpec((bt, C_in, L), lambda b, h: (b, 0, 0)),
            pl.BlockSpec((bt, hb, L, L), lambda b, h: (b, h, 0, 0)),
        ),
        scratch_shapes=[
            pltpu.VMEM((bt * n_heads, head_dim, L), jnp.bfloat16),   # Q slabs
            pltpu.VMEM((bt * n_heads, head_dim, L), jnp.bfloat16),   # K slabs
            pltpu.VMEM((bt * n_heads, head_dim, L), jnp.bfloat16),   # V slabs
            pltpu.VMEM((bt * hidden, L), jnp.float32),               # ctx slab
        ],
        compiler_params=pltpu.CompilerParams(
            dimension_semantics=("parallel", "arbitrary"),
            vmem_limit_bytes=vmem_limit),
    )(x_pack, w_pack, b_pack, wo_b, bo_f)

    return out, attn


def reference(query, key, value, params, n_heads):
    """Pure-JAX f32 reference matching the PyTorch forward (eval mode)."""
    wq, bq, wk, bk, wv, bv, wo, bo = params
    B, C, L = query.shape
    hidden = wq.shape[0]
    d = hidden // n_heads
    scale = math.sqrt(d)

    def conv1x1(x, w, b):                        # x (B,C,L), w (O,C), b (O,1)
        return jnp.einsum('oc,bcl->bol', w, x) + b[None, :, :]

    Q = conv1x1(query, wq, bq).transpose(0, 2, 1)          # (B, L, hidden)
    K = conv1x1(key, wk, bk).transpose(0, 2, 1)
    V = conv1x1(value, wv, bv).transpose(0, 2, 1)
    Q = Q.reshape(B, L, n_heads, d).transpose(0, 2, 1, 3)
    K = K.reshape(B, L, n_heads, d).transpose(0, 2, 1, 3)
    V = V.reshape(B, L, n_heads, d).transpose(0, 2, 1, 3)
    energy = jnp.einsum('bhqd,bhkd->bhqk', Q, K) / scale
    attn = jax.nn.softmax(energy, axis=-1)
    ctx = jnp.einsum('bhqk,bhkd->bhqd', attn, V)
    ctx = ctx.transpose(0, 2, 1, 3).reshape(B, L, hidden).transpose(0, 2, 1)   # (B, hidden, L)
    out = conv1x1(ctx, wo, bo)                              # (B, C, L)
    return out, attn


if __name__ == "__main__":
    # Small shapes consistent with the module: batch=2, in_c=4, seq=16,
    # hidden_c=32, n_heads=4 (head_dim=8), dropout inactive (eval mode).
    B, in_c, L = 2, 4, 16
    hidden_c, n_heads = 32, 4

    root = jax.random.PRNGKey(0)
    ks = jax.random.split(root, 12)

    def uinit(k, shape, fan_in):
        bound = 1.0 / math.sqrt(fan_in)
        return jax.random.uniform(k, shape, jnp.float32, -bound, bound)

    # Conv1d(kernel_size=1) weights channel-major: (out, in); biases (out, 1).
    wq = uinit(ks[0], (hidden_c, in_c), in_c); bq = uinit(ks[1], (hidden_c, 1), in_c)
    wk = uinit(ks[2], (hidden_c, in_c), in_c); bk = uinit(ks[3], (hidden_c, 1), in_c)
    wv = uinit(ks[4], (hidden_c, in_c), in_c); bv = uinit(ks[5], (hidden_c, 1), in_c)
    wo = uinit(ks[6], (in_c, hidden_c), hidden_c); bo = uinit(ks[7], (in_c, 1), hidden_c)
    params = (wq, bq, wk, bk, wv, bv, wo, bo)

    query = jax.random.normal(ks[8], (B, in_c, L), jnp.float32)
    key_in = jax.random.normal(ks[9], (B, in_c, L), jnp.float32)
    value = jax.random.normal(ks[10], (B, in_c, L), jnp.float32)

    out_r, attn_r = reference(query, key_in, value, params, n_heads)

    def check(out, attn, label):
        assert out.shape == (B, in_c, L), label
        assert attn.shape == (B, n_heads, L, L), label
        # bf16 MXU math (f32 accumulation) + bf16 exp on v6e/v7x inside the
        # kernel -> relaxed tolerances vs. the all-f32 reference.
        assert jnp.allclose(attn.astype(jnp.float32), attn_r, atol=1e-2), \
            f"attention mismatch ({label})"
        assert jnp.allclose(out, out_r, atol=4e-2), f"output mismatch ({label})"

    # 1) default adaptive tiling: tiny problem -> a single fused grid step.
    out1, attn1 = multi_head_attention(query, key_in, value, params, n_heads)
    jax.block_until_ready((out1, attn1))
    check(out1, attn1, "default")

    # 2) production tiling forced: batch AND head axes on the grid (exercises
    #    the head-accumulator / dynamic head-slab path).
    out2, attn2 = multi_head_attention(query, key_in, value, params, n_heads,
                                       batch_block=1, head_block=1)
    jax.block_until_ready((out2, attn2))
    check(out2, attn2, "grid")

    # 3) large-C_in fallback forced: separate (non block-diagonal) projections.
    out3, attn3 = multi_head_attention(query, key_in, value, params, n_heads,
                                       fuse_qkv=False)
    jax.block_until_ready((out3, attn3))
    check(out3, attn3, "unfused")

    print("KERNEL_OK")
</pallas_src>

<mosaic_0001>
module attributes {stable_mosaic.version = 11 : i64} {
  func.func @_mha_kernel(%arg0: i32, %arg1: i32, %arg2: memref<2x12x16xbf16, #tpu.memory_space<vmem>>, %arg3: memref<96x12xbf16, #tpu.memory_space<vmem>>, %arg4: memref<96x1xf32, #tpu.memory_space<vmem>>, %arg5: memref<4x32xbf16, #tpu.memory_space<vmem>>, %arg6: memref<4x1xf32, #tpu.memory_space<vmem>>, %arg7: memref<2x4x16xf32, #tpu.memory_space<vmem>>, %arg8: memref<2x4x16x16xf32, #tpu.memory_space<vmem>>, %arg9: memref<8x8x16xbf16, #tpu.memory_space<vmem>>, %arg10: memref<8x8x16xbf16, #tpu.memory_space<vmem>>, %arg11: memref<8x8x16xbf16, #tpu.memory_space<vmem>>, %arg12: memref<64x16xf32, #tpu.memory_space<vmem>>) attributes {dimension_semantics = [#tpu.dimension_semantics<parallel>, #tpu.dimension_semantics<arbitrary>], iteration_bounds = array<i64: 1, 1>, scalar_prefetch = 0 : i64, scratch_operands = 4 : i64, tpu.core_type = #tpu.core_type<tc>, window_params = [{transform_indices = @transform_0, window_bounds = array<i64: 2, 12, 16>}, {pipeline_mode = #tpu.pipeline_mode<synchronous>, transform_indices = @transform_1, window_bounds = array<i64: 96, 12>}, {pipeline_mode = #tpu.pipeline_mode<synchronous>, transform_indices = @transform_2, window_bounds = array<i64: 96, 1>}, {pipeline_mode = #tpu.pipeline_mode<synchronous>, transform_indices = @transform_3, window_bounds = array<i64: 4, 32>}, {pipeline_mode = #tpu.pipeline_mode<synchronous>, transform_indices = @transform_4, window_bounds = array<i64: 4, 1>}, {transform_indices = @transform_5, window_bounds = array<i64: 2, 4, 16>}, {transform_indices = @transform_6, window_bounds = array<i64: 2, 4, 16, 16>}]} {
    %c0_i32 = arith.constant 0 : i32
    %0 = arith.cmpi eq, %arg1, %c0_i32 : i32
    %1 = arith.extui %0 : i1 to i32
    %c0_i32_0 = arith.constant 0 : i32
    %2 = arith.cmpi ne, %1, %c0_i32_0 : i32
    scf.if %2 {
      %c0_139 = arith.constant 0 : index
      %c0_140 = arith.constant 0 : index
      %214 = vector.load %arg3[%c0_139, %c0_140] : memref<96x12xbf16, #tpu.memory_space<vmem>>, vector<96x12xbf16>
      %c0_141 = arith.constant 0 : index
      %c0_142 = arith.constant 0 : index
      %c0_143 = arith.constant 0 : index
      %215 = vector.load %arg2[%c0_141, %c0_142, %c0_143] : memref<2x12x16xbf16, #tpu.memory_space<vmem>>, vector<1x12x16xbf16>
      %216 = vector.shape_cast %215 : vector<1x12x16xbf16> to vector<12x16xbf16>
      %cst_144 = arith.constant dense<0.000000e+00> : vector<96x16xf32>
      %217 = tpu.matmul %214, %216, %cst_144 {dimension_numbers = #tpu.dot_dimension_numbers<[1], [0], [0], [1], [0, 0, 1, 1], [], []>} : vector<96x12xbf16>, vector<12x16xbf16>, vector<96x16xf32> -> vector<96x16xf32>
      %c0_145 = arith.constant 0 : index
      %c0_146 = arith.constant 0 : index
      %218 = vector.load %arg4[%c0_145, %c0_146] : memref<96x1xf32, #tpu.memory_space<vmem>>, vector<96x1xf32>
      %219 = vector.broadcast %218 : vector<96x1xf32> to vector<96x16xf32>
      %220 = arith.addf %217, %219 : vector<96x16xf32>
      %221 = vector.extract_strided_slice %220 {offsets = [0, 0], sizes = [32, 16], strides = [1, 1]} : vector<96x16xf32> to vector<32x16xf32>
      %222 = vector.extract_strided_slice %220 {offsets = [32, 0], sizes = [32, 16], strides = [1, 1]} : vector<96x16xf32> to vector<32x16xf32>
      %223 = vector.extract_strided_slice %220 {offsets = [64, 0], sizes = [32, 16], strides = [1, 1]} : vector<96x16xf32> to vector<32x16xf32>
      %224 = vector.extract_strided_slice %221 {offsets = [0, 0], sizes = [8, 16], strides = [1, 1]} : vector<32x16xf32> to vector<8x16xf32>
      %225 = arith.truncf %224 : vector<8x16xf32> to vector<8x16xbf16>
      %c0_147 = arith.constant 0 : index
      %c0_148 = arith.constant 0 : index
      %c0_149 = arith.constant 0 : index
      %226 = vector.load %arg9[%c0_147, %c0_148, %c0_149] : memref<8x8x16xbf16, #tpu.memory_space<vmem>>, vector<1x8x16xbf16>
      %227 = vector.shape_cast %226 : vector<1x8x16xbf16> to vector<8x16xbf16>
      %228 = vector.shape_cast %225 : vector<8x16xbf16> to vector<1x8x16xbf16>
      tpu.vector_store %arg9[%c0_147, %c0_148, %c0_149], %228 {strides = array<i32>} : memref<8x8x16xbf16, #tpu.memory_space<vmem>>, vector<1x8x16xbf16>,
      %229 = vector.extract_strided_slice %221 {offsets = [8, 0], sizes = [8, 16], strides = [1, 1]} : vector<32x16xf32> to vector<8x16xf32>
      %230 = arith.truncf %229 : vector<8x16xf32> to vector<8x16xbf16>
      %c1_150 = arith.constant 1 : index
      %c0_151 = arith.constant 0 : index
      %c0_152 = arith.constant 0 : index
      %231 = vector.load %arg9[%c1_150, %c0_151, %c0_152] : memref<8x8x16xbf16, #tpu.memory_space<vmem>>, vector<1x8x16xbf16>
      %232 = vector.shape_cast %231 : vector<1x8x16xbf16> to vector<8x16xbf16>
      %233 = vector.shape_cast %230 : vector<8x16xbf16> to vector<1x8x16xbf16>
      tpu.vector_store %arg9[%c1_150, %c0_151, %c0_152], %233 {strides = array<i32>} : memref<8x8x16xbf16, #tpu.memory_space<vmem>>, vector<1x8x16xbf16>,
      %234 = vector.extract_strided_slice %221 {offsets = [16, 0], sizes = [8, 16], strides = [1, 1]} : vector<32x16xf32> to vector<8x16xf32>
      %235 = arith.truncf %234 : vector<8x16xf32> to vector<8x16xbf16>
      %c2_153 = arith.constant 2 : index
      %c0_154 = arith.constant 0 : index
      %c0_155 = arith.constant 0 : index
      %236 = vector.load %arg9[%c2_153, %c0_154, %c0_155] : memref<8x8x16xbf16, #tpu.memory_space<vmem>>, vector<1x8x16xbf16>
      %237 = vector.shape_cast %236 : vector<1x8x16xbf16> to vector<8x16xbf16>
      %238 = vector.shape_cast %235 : vector<8x16xbf16> to vector<1x8x16xbf16>
      tpu.vector_store %arg9[%c2_153, %c0_154, %c0_155], %238 {strides = array<i32>} : memref<8x8x16xbf16, #tpu.memory_space<vmem>>, vector<1x8x16xbf16>,
      %239 = vector.extract_strided_slice %221 {offsets = [24, 0], sizes = [8, 16], strides = [1, 1]} : vector<32x16xf32> to vector<8x16xf32>
      %240 = arith.truncf %239 : vector<8x16xf32> to vector<8x16xbf16>
      %c3_156 = arith.constant 3 : index
      %c0_157 = arith.constant 0 : index
      %c0_158 = arith.constant 0 : index
      %241 = vector.load %arg9[%c3_156, %c0_157, %c0_158] : memref<8x8x16xbf16, #tpu.memory_space<vmem>>, vector<1x8x16xbf16>
      %242 = vector.shape_cast %241 : vector<1x8x16xbf16> to vector<8x16xbf16>
      %243 = vector.shape_cast %240 : vector<8x16xbf16> to vector<1x8x16xbf16>
      tpu.vector_store %arg9[%c3_156, %c0_157, %c0_158], %243 {strides = array<i32>} : memref<8x8x16xbf16, #tpu.memory_space<vmem>>, vector<1x8x16xbf16>,
      %244 = vector.extract_strided_slice %222 {offsets = [0, 0], sizes = [8, 16], strides = [1, 1]} : vector<32x16xf32> to vector<8x16xf32>
      %245 = arith.truncf %244 : vector<8x16xf32> to vector<8x16xbf16>
      %c0_159 = arith.constant 0 : index
      %c0_160 = arith.constant 0 : index
      %c0_161 = arith.constant 0 : index
      %246 = vector.load %arg10[%c0_159, %c0_160, %c0_161] : memref<8x8x16xbf16, #tpu.memory_space<vmem>>, vector<1x8x16xbf16>
      %247 = vector.shape_cast %246 : vector<1x8x16xbf16> to vector<8x16xbf16>
      %248 = vector.shape_cast %245 : vector<8x16xbf16> to vector<1x8x16xbf16>
      tpu.vector_store %arg10[%c0_159, %c0_160, %c0_161], %248 {strides = array<i32>} : memref<8x8x16xbf16, #tpu.memory_space<vmem>>, vector<1x8x16xbf16>,
      %249 = vector.extract_strided_slice %222 {offsets = [8, 0], sizes = [8, 16], strides = [1, 1]} : vector<32x16xf32> to vector<8x16xf32>
      %250 = arith.truncf %249 : vector<8x16xf32> to vector<8x16xbf16>
      %c1_162 = arith.constant 1 : index
      %c0_163 = arith.constant 0 : index
      %c0_164 = arith.constant 0 : index
      %251 = vector.load %arg10[%c1_162, %c0_163, %c0_164] : memref<8x8x16xbf16, #tpu.memory_space<vmem>>, vector<1x8x16xbf16>
      %252 = vector.shape_cast %251 : vector<1x8x16xbf16> to vector<8x16xbf16>
      %253 = vector.shape_cast %250 : vector<8x16xbf16> to vector<1x8x16xbf16>
      tpu.vector_store %arg10[%c1_162, %c0_163, %c0_164], %253 {strides = array<i32>} : memref<8x8x16xbf16, #tpu.memory_space<vmem>>, vector<1x8x16xbf16>,
      %254 = vector.extract_strided_slice %222 {offsets = [16, 0], sizes = [8, 16], strides = [1, 1]} : vector<32x16xf32> to vector<8x16xf32>
      %255 = arith.truncf %254 : vector<8x16xf32> to vector<8x16xbf16>
      %c2_165 = arith.constant 2 : index
      %c0_166 = arith.constant 0 : index
      %c0_167 = arith.constant 0 : index
      %256 = vector.load %arg10[%c2_165, %c0_166, %c0_167] : memref<8x8x16xbf16, #tpu.memory_space<vmem>>, vector<1x8x16xbf16>
      %257 = vector.shape_cast %256 : vector<1x8x16xbf16> to vector<8x16xbf16>
      %258 = vector.shape_cast %255 : vector<8x16xbf16> to vector<1x8x16xbf16>
      tpu.vector_store %arg10[%c2_165, %c0_166, %c0_167], %258 {strides = array<i32>} : memref<8x8x16xbf16, #tpu.memory_space<vmem>>, vector<1x8x16xbf16>,
      %259 = vector.extract_strided_slice %222 {offsets = [24, 0], sizes = [8, 16], strides = [1, 1]} : vector<32x16xf32> to vector<8x16xf32>
      %260 = arith.truncf %259 : vector<8x16xf32> to vector<8x16xbf16>
      %c3_168 = arith.constant 3 : index
      %c0_169 = arith.constant 0 : index
      %c0_170 = arith.constant 0 : index
      %261 = vector.load %arg10[%c3_168, %c0_169, %c0_170] : memref<8x8x16xbf16, #tpu.memory_space<vmem>>, vector<1x8x16xbf16>
      %262 = vector.shape_cast %261 : vector<1x8x16xbf16> to vector<8x16xbf16>
      %263 = vector.shape_cast %260 : vector<8x16xbf16> to vector<1x8x16xbf16>
      tpu.vector_store %arg10[%c3_168, %c0_169, %c0_170], %263 {strides = array<i32>} : memref<8x8x16xbf16, #tpu.memory_space<vmem>>, vector<1x8x16xbf16>,
      %264 = vector.extract_strided_slice %223 {offsets = [0, 0], sizes = [8, 16], strides = [1, 1]} : vector<32x16xf32> to vector<8x16xf32>
      %265 = arith.truncf %264 : vector<8x16xf32> to vector<8x16xbf16>
      %c0_171 = arith.constant 0 : index
      %c0_172 = arith.constant 0 : index
      %c0_173 = arith.constant 0 : index
      %266 = vector.load %arg11[%c0_171, %c0_172, %c0_173] : memref<8x8x16xbf16, #tpu.memory_space<vmem>>, vector<1x8x16xbf16>
      %267 = vector.shape_cast %266 : vector<1x8x16xbf16> to vector<8x16xbf16>
      %268 = vector.shape_cast %265 : vector<8x16xbf16> to vector<1x8x16xbf16>
      tpu.vector_store %arg11[%c0_171, %c0_172, %c0_173], %268 {strides = array<i32>} : memref<8x8x16xbf16, #tpu.memory_space<vmem>>, vector<1x8x16xbf16>,
      %269 = vector.extract_strided_slice %223 {offsets = [8, 0], sizes = [8, 16], strides = [1, 1]} : vector<32x16xf32> to vector<8x16xf32>
      %270 = arith.truncf %269 : vector<8x16xf32> to vector<8x16xbf16>
      %c1_174 = arith.constant 1 : index
      %c0_175 = arith.constant 0 : index
      %c0_176 = arith.constant 0 : index
      %271 = vector.load %arg11[%c1_174, %c0_175, %c0_176] : memref<8x8x16xbf16, #tpu.memory_space<vmem>>, vector<1x8x16xbf16>
      %272 = vector.shape_cast %271 : vector<1x8x16xbf16> to vector<8x16xbf16>
      %273 = vector.shape_cast %270 : vector<8x16xbf16> to vector<1x8x16xbf16>
      tpu.vector_store %arg11[%c1_174, %c0_175, %c0_176], %273 {strides = array<i32>} : memref<8x8x16xbf16, #tpu.memory_space<vmem>>, vector<1x8x16xbf16>,
      %274 = vector.extract_strided_slice %223 {offsets = [16, 0], sizes = [8, 16], strides = [1, 1]} : vector<32x16xf32> to vector<8x16xf32>
      %275 = arith.truncf %274 : vector<8x16xf32> to vector<8x16xbf16>
      %c2_177 = arith.constant 2 : index
      %c0_178 = arith.constant 0 : index
      %c0_179 = arith.constant 0 : index
      %276 = vector.load %arg11[%c2_177, %c0_178, %c0_179] : memref<8x8x16xbf16, #tpu.memory_space<vmem>>, vector<1x8x16xbf16>
      %277 = vector.shape_cast %276 : vector<1x8x16xbf16> to vector<8x16xbf16>
      %278 = vector.shape_cast %275 : vector<8x16xbf16> to vector<1x8x16xbf16>
      tpu.vector_store %arg11[%c2_177, %c0_178, %c0_179], %278 {strides = array<i32>} : memref<8x8x16xbf16, #tpu.memory_space<vmem>>, vector<1x8x16xbf16>,
      %279 = vector.extract_strided_slice %223 {offsets = [24, 0], sizes = [8, 16], strides = [1, 1]} : vector<32x16xf32> to vector<8x16xf32>
      %280 = arith.truncf %279 : vector<8x16xf32> to vector<8x16xbf16>
      %c3_180 = arith.constant 3 : index
      %c0_181 = arith.constant 0 : index
      %c0_182 = arith.constant 0 : index
      %281 = vector.load %arg11[%c3_180, %c0_181, %c0_182] : memref<8x8x16xbf16, #tpu.memory_space<vmem>>, vector<1x8x16xbf16>
      %282 = vector.shape_cast %281 : vector<1x8x16xbf16> to vector<8x16xbf16>
      %283 = vector.shape_cast %280 : vector<8x16xbf16> to vector<1x8x16xbf16>
      tpu.vector_store %arg11[%c3_180, %c0_181, %c0_182], %283 {strides = array<i32>} : memref<8x8x16xbf16, #tpu.memory_space<vmem>>, vector<1x8x16xbf16>,
      %c0_183 = arith.constant 0 : index
      %c0_184 = arith.constant 0 : index
      %284 = vector.load %arg3[%c0_183, %c0_184] : memref<96x12xbf16, #tpu.memory_space<vmem>>, vector<96x12xbf16>
      %c1_185 = arith.constant 1 : index
      %c0_186 = arith.constant 0 : index
      %c0_187 = arith.constant 0 : index
      %285 = vector.load %arg2[%c1_185, %c0_186, %c0_187] : memref<2x12x16xbf16, #tpu.memory_space<vmem>>, vector<1x12x16xbf16>
      %286 = vector.shape_cast %285 : vector<1x12x16xbf16> to vector<12x16xbf16>
      %cst_188 = arith.constant dense<0.000000e+00> : vector<96x16xf32>
      %287 = tpu.matmul %284, %286, %cst_188 {dimension_numbers = #tpu.dot_dimension_numbers<[1], [0], [0], [1], [0, 0, 1, 1], [], []>} : vector<96x12xbf16>, vector<12x16xbf16>, vector<96x16xf32> -> vector<96x16xf32>
      %c0_189 = arith.constant 0 : index
      %c0_190 = arith.constant 0 : index
      %288 = vector.load %arg4[%c0_189, %c0_190] : memref<96x1xf32, #tpu.memory_space<vmem>>, vector<96x1xf32>
      %289 = vector.broadcast %288 : vector<96x1xf32> to vector<96x16xf32>
      %290 = arith.addf %287, %289 : vector<96x16xf32>
      %291 = vector.extract_strided_slice %290 {offsets = [0, 0], sizes = [32, 16], strides = [1, 1]} : vector<96x16xf32> to vector<32x16xf32>
      %292 = vector.extract_strided_slice %290 {offsets = [32, 0], sizes = [32, 16], strides = [1, 1]} : vector<96x16xf32> to vector<32x16xf32>
      %293 = vector.extract_strided_slice %290 {offsets = [64, 0], sizes = [32, 16], strides = [1, 1]} : vector<96x16xf32> to vector<32x16xf32>
      %294 = vector.extract_strided_slice %291 {offsets = [0, 0], sizes = [8, 16], strides = [1, 1]} : vector<32x16xf32> to vector<8x16xf32>
      %295 = arith.truncf %294 : vector<8x16xf32> to vector<8x16xbf16>
      %c4_191 = arith.constant 4 : index
      %c0_192 = arith.constant 0 : index
      %c0_193 = arith.constant 0 : index
      %296 = vector.load %arg9[%c4_191, %c0_192, %c0_193] : memref<8x8x16xbf16, #tpu.memory_space<vmem>>, vector<1x8x16xbf16>
      %297 = vector.shape_cast %296 : vector<1x8x16xbf16> to vector<8x16xbf16>
      %298 = vector.shape_cast %295 : vector<8x16xbf16> to vector<1x8x16xbf16>
      tpu.vector_store %arg9[%c4_191, %c0_192, %c0_193], %298 {strides = array<i32>} : memref<8x8x16xbf16, #tpu.memory_space<vmem>>, vector<1x8x16xbf16>,
      %299 = vector.extract_strided_slice %291 {offsets = [8, 0], sizes = [8, 16], strides = [1, 1]} : vector<32x16xf32> to vector<8x16xf32>
      %300 = arith.truncf %299 : vector<8x16xf32> to vector<8x16xbf16>
      %c5_194 = arith.constant 5 : index
      %c0_195 = arith.constant 0 : index
      %c0_196 = arith.constant 0 : index
      %301 = vector.load %arg9[%c5_194, %c0_195, %c0_196] : memref<8x8x16xbf16, #tpu.memory_space<vmem>>, vector<1x8x16xbf16>
      %302 = vector.shape_cast %301 : vector<1x8x16xbf16> to vector<8x16xbf16>
      %303 = vector.shape_cast %300 : vector<8x16xbf16> to vector<1x8x16xbf16>
      tpu.vector_store %arg9[%c5_194, %c0_195, %c0_196], %303 {strides = array<i32>} : memref<8x8x16xbf16, #tpu.memory_space<vmem>>, vector<1x8x16xbf16>,
      %304 = vector.extract_strided_slice %291 {offsets = [16, 0], sizes = [8, 16], strides = [1, 1]} : vector<32x16xf32> to vector<8x16xf32>
      %305 = arith.truncf %304 : vector<8x16xf32> to vector<8x16xbf16>
      %c6_197 = arith.constant 6 : index
      %c0_198 = arith.constant 0 : index
      %c0_199 = arith.constant 0 : index
      %306 = vector.load %arg9[%c6_197, %c0_198, %c0_199] : memref<8x8x16xbf16, #tpu.memory_space<vmem>>, vector<1x8x16xbf16>
      %307 = vector.shape_cast %306 : vector<1x8x16xbf16> to vector<8x16xbf16>
      %308 = vector.shape_cast %305 : vector<8x16xbf16> to vector<1x8x16xbf16>
      tpu.vector_store %arg9[%c6_197, %c0_198, %c0_199], %308 {strides = array<i32>} : memref<8x8x16xbf16, #tpu.memory_space<vmem>>, vector<1x8x16xbf16>,
      %309 = vector.extract_strided_slice %291 {offsets = [24, 0], sizes = [8, 16], strides = [1, 1]} : vector<32x16xf32> to vector<8x16xf32>
      %310 = arith.truncf %309 : vector<8x16xf32> to vector<8x16xbf16>
      %c7_200 = arith.constant 7 : index
      %c0_201 = arith.constant 0 : index
      %c0_202 = arith.constant 0 : index
      %311 = vector.load %arg9[%c7_200, %c0_201, %c0_202] : memref<8x8x16xbf16, #tpu.memory_space<vmem>>, vector<1x8x16xbf16>
      %312 = vector.shape_cast %311 : vector<1x8x16xbf16> to vector<8x16xbf16>
      %313 = vector.shape_cast %310 : vector<8x16xbf16> to vector<1x8x16xbf16>
      tpu.vector_store %arg9[%c7_200, %c0_201, %c0_202], %313 {strides = array<i32>} : memref<8x8x16xbf16, #tpu.memory_space<vmem>>, vector<1x8x16xbf16>,
      %314 = vector.extract_strided_slice %292 {offsets = [0, 0], sizes = [8, 16], strides = [1, 1]} : vector<32x16xf32> to vector<8x16xf32>
      %315 = arith.truncf %314 : vector<8x16xf32> to vector<8x16xbf16>
      %c4_203 = arith.constant 4 : index
      %c0_204 = arith.constant 0 : index
      %c0_205 = arith.constant 0 : index
      %316 = vector.load %arg10[%c4_203, %c0_204, %c0_205] : memref<8x8x16xbf16, #tpu.memory_space<vmem>>, vector<1x8x16xbf16>
      %317 = vector.shape_cast %316 : vector<1x8x16xbf16> to vector<8x16xbf16>
      %318 = vector.shape_cast %315 : vector<8x16xbf16> to vector<1x8x16xbf16>
      tpu.vector_store %arg10[%c4_203, %c0_204, %c0_205], %318 {strides = array<i32>} : memref<8x8x16xbf16, #tpu.memory_space<vmem>>, vector<1x8x16xbf16>,
      %319 = vector.extract_strided_slice %292 {offsets = [8, 0], sizes = [8, 16], strides = [1, 1]} : vector<32x16xf32> to vector<8x16xf32>
      %320 = arith.truncf %319 : vector<8x16xf32> to vector<8x16xbf16>
      %c5_206 = arith.constant 5 : index
      %c0_207 = arith.constant 0 : index
      %c0_208 = arith.constant 0 : index
      %321 = vector.load %arg10[%c5_206, %c0_207, %c0_208] : memref<8x8x16xbf16, #tpu.memory_space<vmem>>, vector<1x8x16xbf16>
      %322 = vector.shape_cast %321 : vector<1x8x16xbf16> to vector<8x16xbf16>
      %323 = vector.shape_cast %320 : vector<8x16xbf16> to vector<1x8x16xbf16>
      tpu.vector_store %arg10[%c5_206, %c0_207, %c0_208], %323 {strides = array<i32>} : memref<8x8x16xbf16, #tpu.memory_space<vmem>>, vector<1x8x16xbf16>,
      %324 = vector.extract_strided_slice %292 {offsets = [16, 0], sizes = [8, 16], strides = [1, 1]} : vector<32x16xf32> to vector<8x16xf32>
      %325 = arith.truncf %324 : vector<8x16xf32> to vector<8x16xbf16>
      %c6_209 = arith.constant 6 : index
      %c0_210 = arith.constant 0 : index
      %c0_211 = arith.constant 0 : index
      %326 = vector.load %arg10[%c6_209, %c0_210, %c0_211] : memref<8x8x16xbf16, #tpu.memory_space<vmem>>, vector<1x8x16xbf16>
      %327 = vector.shape_cast %326 : vector<1x8x16xbf16> to vector<8x16xbf16>
      %328 = vector.shape_cast %325 : vector<8x16xbf16> to vector<1x8x16xbf16>
      tpu.vector_store %arg10[%c6_209, %c0_210, %c0_211], %328 {strides = array<i32>} : memref<8x8x16xbf16, #tpu.memory_space<vmem>>, vector<1x8x16xbf16>,
      %329 = vector.extract_strided_slice %292 {offsets = [24, 0], sizes = [8, 16], strides = [1, 1]} : vector<32x16xf32> to vector<8x16xf32>
      %330 = arith.truncf %329 : vector<8x16xf32> to vector<8x16xbf16>
      %c7_212 = arith.constant 7 : index
      %c0_213 = arith.constant 0 : index
      %c0_214 = arith.constant 0 : index
      %331 = vector.load %arg10[%c7_212, %c0_213, %c0_214] : memref<8x8x16xbf16, #tpu.memory_space<vmem>>, vector<1x8x16xbf16>
      %332 = vector.shape_cast %331 : vector<1x8x16xbf16> to vector<8x16xbf16>
      %333 = vector.shape_cast %330 : vector<8x16xbf16> to vector<1x8x16xbf16>
      tpu.vector_store %arg10[%c7_212, %c0_213, %c0_214], %333 {strides = array<i32>} : memref<8x8x16xbf16, #tpu.memory_space<vmem>>, vector<1x8x16xbf16>,
      %334 = vector.extract_strided_slice %293 {offsets = [0, 0], sizes = [8, 16], strides = [1, 1]} : vector<32x16xf32> to vector<8x16xf32>
      %335 = arith.truncf %334 : vector<8x16xf32> to vector<8x16xbf16>
      %c4_215 = arith.constant 4 : index
      %c0_216 = arith.constant 0 : index
      %c0_217 = arith.constant 0 : index
      %336 = vector.load %arg11[%c4_215, %c0_216, %c0_217] : memref<8x8x16xbf16, #tpu.memory_space<vmem>>, vector<1x8x16xbf16>
      %337 = vector.shape_cast %336 : vector<1x8x16xbf16> to vector<8x16xbf16>
      %338 = vector.shape_cast %335 : vector<8x16xbf16> to vector<1x8x16xbf16>
      tpu.vector_store %arg11[%c4_215, %c0_216, %c0_217], %338 {strides = array<i32>} : memref<8x8x16xbf16, #tpu.memory_space<vmem>>, vector<1x8x16xbf16>,
      %339 = vector.extract_strided_slice %293 {offsets = [8, 0], sizes = [8, 16], strides = [1, 1]} : vector<32x16xf32> to vector<8x16xf32>
      %340 = arith.truncf %339 : vector<8x16xf32> to vector<8x16xbf16>
      %c5_218 = arith.constant 5 : index
      %c0_219 = arith.constant 0 : index
      %c0_220 = arith.constant 0 : index
      %341 = vector.load %arg11[%c5_218, %c0_219, %c0_220] : memref<8x8x16xbf16, #tpu.memory_space<vmem>>, vector<1x8x16xbf16>
      %342 = vector.shape_cast %341 : vector<1x8x16xbf16> to vector<8x16xbf16>
      %343 = vector.shape_cast %340 : vector<8x16xbf16> to vector<1x8x16xbf16>
      tpu.vector_store %arg11[%c5_218, %c0_219, %c0_220], %343 {strides = array<i32>} : memref<8x8x16xbf16, #tpu.memory_space<vmem>>, vector<1x8x16xbf16>,
      %344 = vector.extract_strided_slice %293 {offsets = [16, 0], sizes = [8, 16], strides = [1, 1]} : vector<32x16xf32> to vector<8x16xf32>
      %345 = arith.truncf %344 : vector<8x16xf32> to vector<8x16xbf16>
      %c6_221 = arith.constant 6 : index
      %c0_222 = arith.constant 0 : index
      %c0_223 = arith.constant 0 : index
      %346 = vector.load %arg11[%c6_221, %c0_222, %c0_223] : memref<8x8x16xbf16, #tpu.memory_space<vmem>>, vector<1x8x16xbf16>
      %347 = vector.shape_cast %346 : vector<1x8x16xbf16> to vector<8x16xbf16>
      %348 = vector.shape_cast %345 : vector<8x16xbf16> to vector<1x8x16xbf16>
      tpu.vector_store %arg11[%c6_221, %c0_222, %c0_223], %348 {strides = array<i32>} : memref<8x8x16xbf16, #tpu.memory_space<vmem>>, vector<1x8x16xbf16>,
      %349 = vector.extract_strided_slice %293 {offsets = [24, 0], sizes = [8, 16], strides = [1, 1]} : vector<32x16xf32> to vector<8x16xf32>
      %350 = arith.truncf %349 : vector<8x16xf32> to vector<8x16xbf16>
      %c7_224 = arith.constant 7 : index
      %c0_225 = arith.constant 0 : index
      %c0_226 = arith.constant 0 : index
      %351 = vector.load %arg11[%c7_224, %c0_225, %c0_226] : memref<8x8x16xbf16, #tpu.memory_space<vmem>>, vector<1x8x16xbf16>
      %352 = vector.shape_cast %351 : vector<1x8x16xbf16> to vector<8x16xbf16>
      %353 = vector.shape_cast %350 : vector<8x16xbf16> to vector<1x8x16xbf16>
      tpu.vector_store %arg11[%c7_224, %c0_225, %c0_226], %353 {strides = array<i32>} : memref<8x8x16xbf16, #tpu.memory_space<vmem>>, vector<1x8x16xbf16>,
    } else {
    }
    %c0 = arith.constant 0 : index
    %c0_1 = arith.constant 0 : index
    %c0_2 = arith.constant 0 : index
    %3 = vector.load %arg9[%c0, %c0_1, %c0_2] : memref<8x8x16xbf16, #tpu.memory_space<vmem>>, vector<1x8x16xbf16>
    %4 = vector.shape_cast %3 : vector<1x8x16xbf16> to vector<8x16xbf16>
    %c0_3 = arith.constant 0 : index
    %c0_4 = arith.constant 0 : index
    %c0_5 = arith.constant 0 : index
    %5 = vector.load %arg10[%c0_3, %c0_4, %c0_5] : memref<8x8x16xbf16, #tpu.memory_space<vmem>>, vector<1x8x16xbf16>
    %6 = vector.shape_cast %5 : vector<1x8x16xbf16> to vector<8x16xbf16>
    %c0_6 = arith.constant 0 : index
    %c0_7 = arith.constant 0 : index
    %c0_8 = arith.constant 0 : index
    %7 = vector.load %arg11[%c0_6, %c0_7, %c0_8] : memref<8x8x16xbf16, #tpu.memory_space<vmem>>, vector<1x8x16xbf16>
    %8 = vector.shape_cast %7 : vector<1x8x16xbf16> to vector<8x16xbf16>
    %cst = arith.constant dense<0.000000e+00> : vector<16x16xf32>
    %9 = tpu.matmul %4, %6, %cst {dimension_numbers = #tpu.dot_dimension_numbers<[0], [0], [1], [1], [0, 1, 1, 1], [], []>} : vector<8x16xbf16>, vector<8x16xbf16>, vector<16x16xf32> -> vector<16x16xf32>
    %cst_9 = arith.constant dense<0xFF800000> : vector<16xf32>
    %10 = vector.multi_reduction <maximumf>, %9, %cst_9 [1] : vector<16x16xf32> to vector<16xf32>
    %11 = vector.shape_cast %10 : vector<16xf32> to vector<16x1xf32>
    %12 = vector.broadcast %11 : vector<16x1xf32> to vector<16x16xf32>
    %13 = arith.subf %9, %12 : vector<16x16xf32>
    %14 = arith.truncf %13 : vector<16x16xf32> to vector<16x16xbf16>
    %15 = math.exp %14 : vector<16x16xbf16>
    %16 = arith.extf %15 : vector<16x16xbf16> to vector<16x16xf32>
    %cst_10 = arith.constant dense<0.000000e+00> : vector<16xf32>
    %17 = vector.multi_reduction <add>, %16, %cst_10 [1] : vector<16x16xf32> to vector<16xf32>
    %18 = vector.shape_cast %17 : vector<16xf32> to vector<16x1xf32>
    %19 = arith.extf %15 : vector<16x16xbf16> to vector<16x16xf32>
    %20 = tpu.reciprocal %18 : vector<16x1xf32> -> vector<16x1xf32>
    %21 = vector.broadcast %20 : vector<16x1xf32> to vector<16x16xf32>
    %22 = arith.mulf %19, %21 : vector<16x16xf32>
    %c0_11 = arith.constant 0 : index
    %c0_12 = arith.constant 0 : index
    %c0_13 = arith.constant 0 : index
    %c0_14 = arith.constant 0 : index
    %23 = vector.load %arg8[%c0_11, %c0_12, %c0_13, %c0_14] : memref<2x4x16x16xf32, #tpu.memory_space<vmem>>, vector<1x1x16x16xf32>
    %24 = vector.shape_cast %23 : vector<1x1x16x16xf32> to vector<16x16xf32>
    %25 = vector.shape_cast %22 : vector<16x16xf32> to vector<1x1x16x16xf32>
    tpu.vector_store %arg8[%c0_11, %c0_12, %c0_13, %c0_14], %25 {strides = array<i32>} : memref<2x4x16x16xf32, #tpu.memory_space<vmem>>, vector<1x1x16x16xf32>,
    %26 = arith.truncf %22 : vector<16x16xf32> to vector<16x16xbf16>
    %cst_15 = arith.constant dense<0.000000e+00> : vector<8x16xf32>
    %27 = tpu.matmul %8, %26, %cst_15 {dimension_numbers = #tpu.dot_dimension_numbers<[1], [1], [0], [0], [0, 0, 1, 0], [], []>} : vector<8x16xbf16>, vector<16x16xbf16>, vector<8x16xf32> -> vector<8x16xf32>
    %c0_16 = arith.constant 0 : index
    %c0_17 = arith.constant 0 : index
    %28 = vector.load %arg12[%c0_16, %c0_17] : memref<64x16xf32, #tpu.memory_space<vmem>>, vector<8x16xf32>
    tpu.vector_store %arg12[%c0_16, %c0_17], %27 {strides = array<i32>} : memref<64x16xf32, #tpu.memory_space<vmem>>, vector<8x16xf32>,
    %c1 = arith.constant 1 : index
    %c0_18 = arith.constant 0 : index
    %c0_19 = arith.constant 0 : index
    %29 = vector.load %arg9[%c1, %c0_18, %c0_19] : memref<8x8x16xbf16, #tpu.memory_space<vmem>>, vector<1x8x16xbf16>
    %30 = vector.shape_cast %29 : vector<1x8x16xbf16> to vector<8x16xbf16>
    %c1_20 = arith.constant 1 : index
    %c0_21 = arith.constant 0 : index
    %c0_22 = arith.constant 0 : index
    %31 = vector.load %arg10[%c1_20, %c0_21, %c0_22] : memref<8x8x16xbf16, #tpu.memory_space<vmem>>, vector<1x8x16xbf16>
    %32 = vector.shape_cast %31 : vector<1x8x16xbf16> to vector<8x16xbf16>
    %c1_23 = arith.constant 1 : index
    %c0_24 = arith.constant 0 : index
    %c0_25 = arith.constant 0 : index
    %33 = vector.load %arg11[%c1_23, %c0_24, %c0_25] : memref<8x8x16xbf16, #tpu.memory_space<vmem>>, vector<1x8x16xbf16>
    %34 = vector.shape_cast %33 : vector<1x8x16xbf16> to vector<8x16xbf16>
    %cst_26 = arith.constant dense<0.000000e+00> : vector<16x16xf32>
    %35 = tpu.matmul %30, %32, %cst_26 {dimension_numbers = #tpu.dot_dimension_numbers<[0], [0], [1], [1], [0, 1, 1, 1], [], []>} : vector<8x16xbf16>, vector<8x16xbf16>, vector<16x16xf32> -> vector<16x16xf32>
    %cst_27 = arith.constant dense<0xFF800000> : vector<16xf32>
    %36 = vector.multi_reduction <maximumf>, %35, %cst_27 [1] : vector<16x16xf32> to vector<16xf32>
    %37 = vector.shape_cast %36 : vector<16xf32> to vector<16x1xf32>
    %38 = vector.broadcast %37 : vector<16x1xf32> to vector<16x16xf32>
    %39 = arith.subf %35, %38 : vector<16x16xf32>
    %40 = arith.truncf %39 : vector<16x16xf32> to vector<16x16xbf16>
    %41 = math.exp %40 : vector<16x16xbf16>
    %42 = arith.extf %41 : vector<16x16xbf16> to vector<16x16xf32>
    %cst_28 = arith.constant dense<0.000000e+00> : vector<16xf32>
    %43 = vector.multi_reduction <add>, %42, %cst_28 [1] : vector<16x16xf32> to vector<16xf32>
    %44 = vector.shape_cast %43 : vector<16xf32> to vector<16x1xf32>
    %45 = arith.extf %41 : vector<16x16xbf16> to vector<16x16xf32>
    %46 = tpu.reciprocal %44 : vector<16x1xf32> -> vector<16x1xf32>
    %47 = vector.broadcast %46 : vector<16x1xf32> to vector<16x16xf32>
    %48 = arith.mulf %45, %47 : vector<16x16xf32>
    %c0_29 = arith.constant 0 : index
    %c1_30 = arith.constant 1 : index
    %c0_31 = arith.constant 0 : index
    %c0_32 = arith.constant 0 : index
    %49 = vector.load %arg8[%c0_29, %c1_30, %c0_31, %c0_32] : memref<2x4x16x16xf32, #tpu.memory_space<vmem>>, vector<1x1x16x16xf32>
    %50 = vector.shape_cast %49 : vector<1x1x16x16xf32> to vector<16x16xf32>
    %51 = vector.shape_cast %48 : vector<16x16xf32> to vector<1x1x16x16xf32>
    tpu.vector_store %arg8[%c0_29, %c1_30, %c0_31, %c0_32], %51 {strides = array<i32>} : memref<2x4x16x16xf32, #tpu.memory_space<vmem>>, vector<1x1x16x16xf32>,
    %52 = arith.truncf %48 : vector<16x16xf32> to vector<16x16xbf16>
    %cst_33 = arith.constant dense<0.000000e+00> : vector<8x16xf32>
    %53 = tpu.matmul %34, %52, %cst_33 {dimension_numbers = #tpu.dot_dimension_numbers<[1], [1], [0], [0], [0, 0, 1, 0], [], []>} : vector<8x16xbf16>, vector<16x16xbf16>, vector<8x16xf32> -> vector<8x16xf32>
    %c8 = arith.constant 8 : index
    %c0_34 = arith.constant 0 : index
    %54 = vector.load %arg12[%c8, %c0_34] : memref<64x16xf32, #tpu.memory_space<vmem>>, vector<8x16xf32>
    tpu.vector_store %arg12[%c8, %c0_34], %53 {strides = array<i32>} : memref<64x16xf32, #tpu.memory_space<vmem>>, vector<8x16xf32>,
    %c2 = arith.constant 2 : index
    %c0_35 = arith.constant 0 : index
    %c0_36 = arith.constant 0 : index
    %55 = vector.load %arg9[%c2, %c0_35, %c0_36] : memref<8x8x16xbf16, #tpu.memory_space<vmem>>, vector<1x8x16xbf16>
    %56 = vector.shape_cast %55 : vector<1x8x16xbf16> to vector<8x16xbf16>
    %c2_37 = arith.constant 2 : index
    %c0_38 = arith.constant 0 : index
    %c0_39 = arith.constant 0 : index
    %57 = vector.load %arg10[%c2_37, %c0_38, %c0_39] : memref<8x8x16xbf16, #tpu.memory_space<vmem>>, vector<1x8x16xbf16>
    %58 = vector.shape_cast %57 : vector<1x8x16xbf16> to vector<8x16xbf16>
    %c2_40 = arith.constant 2 : index
    %c0_41 = arith.constant 0 : index
    %c0_42 = arith.constant 0 : index
    %59 = vector.load %arg11[%c2_40, %c0_41, %c0_42] : memref<8x8x16xbf16, #tpu.memory_space<vmem>>, vector<1x8x16xbf16>
    %60 = vector.shape_cast %59 : vector<1x8x16xbf16> to vector<8x16xbf16>
    %cst_43 = arith.constant dense<0.000000e+00> : vector<16x16xf32>
    %61 = tpu.matmul %56, %58, %cst_43 {dimension_numbers = #tpu.dot_dimension_numbers<[0], [0], [1], [1], [0, 1, 1, 1], [], []>} : vector<8x16xbf16>, vector<8x16xbf16>, vector<16x16xf32> -> vector<16x16xf32>
    %cst_44 = arith.constant dense<0xFF800000> : vector<16xf32>
    %62 = vector.multi_reduction <maximumf>, %61, %cst_44 [1] : vector<16x16xf32> to vector<16xf32>
    %63 = vector.shape_cast %62 : vector<16xf32> to vector<16x1xf32>
    %64 = vector.broadcast %63 : vector<16x1xf32> to vector<16x16xf32>
    %65 = arith.subf %61, %64 : vector<16x16xf32>
    %66 = arith.truncf %65 : vector<16x16xf32> to vector<16x16xbf16>
    %67 = math.exp %66 : vector<16x16xbf16>
    %68 = arith.extf %67 : vector<16x16xbf16> to vector<16x16xf32>
    %cst_45 = arith.constant dense<0.000000e+00> : vector<16xf32>
    %69 = vector.multi_reduction <add>, %68, %cst_45 [1] : vector<16x16xf32> to vector<16xf32>
    %70 = vector.shape_cast %69 : vector<16xf32> to vector<16x1xf32>
    %71 = arith.extf %67 : vector<16x16xbf16> to vector<16x16xf32>
    %72 = tpu.reciprocal %70 : vector<16x1xf32> -> vector<16x1xf32>
    %73 = vector.broadcast %72 : vector<16x1xf32> to vector<16x16xf32>
    %74 = arith.mulf %71, %73 : vector<16x16xf32>
    %c0_46 = arith.constant 0 : index
    %c2_47 = arith.constant 2 : index
    %c0_48 = arith.constant 0 : index
    %c0_49 = arith.constant 0 : index
    %75 = vector.load %arg8[%c0_46, %c2_47, %c0_48, %c0_49] : memref<2x4x16x16xf32, #tpu.memory_space<vmem>>, vector<1x1x16x16xf32>
    %76 = vector.shape_cast %75 : vector<1x1x16x16xf32> to vector<16x16xf32>
    %77 = vector.shape_cast %74 : vector<16x16xf32> to vector<1x1x16x16xf32>
    tpu.vector_store %arg8[%c0_46, %c2_47, %c0_48, %c0_49], %77 {strides = array<i32>} : memref<2x4x16x16xf32, #tpu.memory_space<vmem>>, vector<1x1x16x16xf32>,
    %78 = arith.truncf %74 : vector<16x16xf32> to vector<16x16xbf16>
    %cst_50 = arith.constant dense<0.000000e+00> : vector<8x16xf32>
    %79 = tpu.matmul %60, %78, %cst_50 {dimension_numbers = #tpu.dot_dimension_numbers<[1], [1], [0], [0], [0, 0, 1, 0], [], []>} : vector<8x16xbf16>, vector<16x16xbf16>, vector<8x16xf32> -> vector<8x16xf32>
    %c16 = arith.constant 16 : index
    %c0_51 = arith.constant 0 : index
    %80 = vector.load %arg12[%c16, %c0_51] : memref<64x16xf32, #tpu.memory_space<vmem>>, vector<8x16xf32>
    tpu.vector_store %arg12[%c16, %c0_51], %79 {strides = array<i32>} : memref<64x16xf32, #tpu.memory_space<vmem>>, vector<8x16xf32>,
    %c3 = arith.constant 3 : index
    %c0_52 = arith.constant 0 : index
    %c0_53 = arith.constant 0 : index
    %81 = vector.load %arg9[%c3, %c0_52, %c0_53] : memref<8x8x16xbf16, #tpu.memory_space<vmem>>, vector<1x8x16xbf16>
    %82 = vector.shape_cast %81 : vector<1x8x16xbf16> to vector<8x16xbf16>
    %c3_54 = arith.constant 3 : index
    %c0_55 = arith.constant 0 : index
    %c0_56 = arith.constant 0 : index
    %83 = vector.load %arg10[%c3_54, %c0_55, %c0_56] : memref<8x8x16xbf16, #tpu.memory_space<vmem>>, vector<1x8x16xbf16>
    %84 = vector.shape_cast %83 : vector<1x8x16xbf16> to vector<8x16xbf16>
    %c3_57 = arith.constant 3 : index
    %c0_58 = arith.constant 0 : index
    %c0_59 = arith.constant 0 : index
    %85 = vector.load %arg11[%c3_57, %c0_58, %c0_59] : memref<8x8x16xbf16, #tpu.memory_space<vmem>>, vector<1x8x16xbf16>
    %86 = vector.shape_cast %85 : vector<1x8x16xbf16> to vector<8x16xbf16>
    %cst_60 = arith.constant dense<0.000000e+00> : vector<16x16xf32>
    %87 = tpu.matmul %82, %84, %cst_60 {dimension_numbers = #tpu.dot_dimension_numbers<[0], [0], [1], [1], [0, 1, 1, 1], [], []>} : vector<8x16xbf16>, vector<8x16xbf16>, vector<16x16xf32> -> vector<16x16xf32>
    %cst_61 = arith.constant dense<0xFF800000> : vector<16xf32>
    %88 = vector.multi_reduction <maximumf>, %87, %cst_61 [1] : vector<16x16xf32> to vector<16xf32>
    %89 = vector.shape_cast %88 : vector<16xf32> to vector<16x1xf32>
    %90 = vector.broadcast %89 : vector<16x1xf32> to vector<16x16xf32>
    %91 = arith.subf %87, %90 : vector<16x16xf32>
    %92 = arith.truncf %91 : vector<16x16xf32> to vector<16x16xbf16>
    %93 = math.exp %92 : vector<16x16xbf16>
    %94 = arith.extf %93 : vector<16x16xbf16> to vector<16x16xf32>
    %cst_62 = arith.constant dense<0.000000e+00> : vector<16xf32>
    %95 = vector.multi_reduction <add>, %94, %cst_62 [1] : vector<16x16xf32> to vector<16xf32>
    %96 = vector.shape_cast %95 : vector<16xf32> to vector<16x1xf32>
    %97 = arith.extf %93 : vector<16x16xbf16> to vector<16x16xf32>
    %98 = tpu.reciprocal %96 : vector<16x1xf32> -> vector<16x1xf32>
    %99 = vector.broadcast %98 : vector<16x1xf32> to vector<16x16xf32>
    %100 = arith.mulf %97, %99 : vector<16x16xf32>
    %c0_63 = arith.constant 0 : index
    %c3_64 = arith.constant 3 : index
    %c0_65 = arith.constant 0 : index
    %c0_66 = arith.constant 0 : index
    %101 = vector.load %arg8[%c0_63, %c3_64, %c0_65, %c0_66] : memref<2x4x16x16xf32, #tpu.memory_space<vmem>>, vector<1x1x16x16xf32>
    %102 = vector.shape_cast %101 : vector<1x1x16x16xf32> to vector<16x16xf32>
    %103 = vector.shape_cast %100 : vector<16x16xf32> to vector<1x1x16x16xf32>
    tpu.vector_store %arg8[%c0_63, %c3_64, %c0_65, %c0_66], %103 {strides = array<i32>} : memref<2x4x16x16xf32, #tpu.memory_space<vmem>>, vector<1x1x16x16xf32>,
    %104 = arith.truncf %100 : vector<16x16xf32> to vector<16x16xbf16>
    %cst_67 = arith.constant dense<0.000000e+00> : vector<8x16xf32>
    %105 = tpu.matmul %86, %104, %cst_67 {dimension_numbers = #tpu.dot_dimension_numbers<[1], [1], [0], [0], [0, 0, 1, 0], [], []>} : vector<8x16xbf16>, vector<16x16xbf16>, vector<8x16xf32> -> vector<8x16xf32>
    %c24 = arith.constant 24 : index
    %c0_68 = arith.constant 0 : index
    %106 = vector.load %arg12[%c24, %c0_68] : memref<64x16xf32, #tpu.memory_space<vmem>>, vector<8x16xf32>
    tpu.vector_store %arg12[%c24, %c0_68], %105 {strides = array<i32>} : memref<64x16xf32, #tpu.memory_space<vmem>>, vector<8x16xf32>,
    %c4 = arith.constant 4 : index
    %c0_69 = arith.constant 0 : index
    %c0_70 = arith.constant 0 : index
    %107 = vector.load %arg9[%c4, %c0_69, %c0_70] : memref<8x8x16xbf16, #tpu.memory_space<vmem>>, vector<1x8x16xbf16>
    %108 = vector.shape_cast %107 : vector<1x8x16xbf16> to vector<8x16xbf16>
    %c4_71 = arith.constant 4 : index
    %c0_72 = arith.constant 0 : index
    %c0_73 = arith.constant 0 : index
    %109 = vector.load %arg10[%c4_71, %c0_72, %c0_73] : memref<8x8x16xbf16, #tpu.memory_space<vmem>>, vector<1x8x16xbf16>
    %110 = vector.shape_cast %109 : vector<1x8x16xbf16> to vector<8x16xbf16>
    %c4_74 = arith.constant 4 : index
    %c0_75 = arith.constant 0 : index
    %c0_76 = arith.constant 0 : index
    %111 = vector.load %arg11[%c4_74, %c0_75, %c0_76] : memref<8x8x16xbf16, #tpu.memory_space<vmem>>, vector<1x8x16xbf16>
    %112 = vector.shape_cast %111 : vector<1x8x16xbf16> to vector<8x16xbf16>
    %cst_77 = arith.constant dense<0.000000e+00> : vector<16x16xf32>
    %113 = tpu.matmul %108, %110, %cst_77 {dimension_numbers = #tpu.dot_dimension_numbers<[0], [0], [1], [1], [0, 1, 1, 1], [], []>} : vector<8x16xbf16>, vector<8x16xbf16>, vector<16x16xf32> -> vector<16x16xf32>
    %cst_78 = arith.constant dense<0xFF800000> : vector<16xf32>
    %114 = vector.multi_reduction <maximumf>, %113, %cst_78 [1] : vector<16x16xf32> to vector<16xf32>
    %115 = vector.shape_cast %114 : vector<16xf32> to vector<16x1xf32>
    %116 = vector.broadcast %115 : vector<16x1xf32> to vector<16x16xf32>
    %117 = arith.subf %113, %116 : vector<16x16xf32>
    %118 = arith.truncf %117 : vector<16x16xf32> to vector<16x16xbf16>
    %119 = math.exp %118 : vector<16x16xbf16>
    %120 = arith.extf %119 : vector<16x16xbf16> to vector<16x16xf32>
    %cst_79 = arith.constant dense<0.000000e+00> : vector<16xf32>
    %121 = vector.multi_reduction <add>, %120, %cst_79 [1] : vector<16x16xf32> to vector<16xf32>
    %122 = vector.shape_cast %121 : vector<16xf32> to vector<16x1xf32>
    %123 = arith.extf %119 : vector<16x16xbf16> to vector<16x16xf32>
    %124 = tpu.reciprocal %122 : vector<16x1xf32> -> vector<16x1xf32>
    %125 = vector.broadcast %124 : vector<16x1xf32> to vector<16x16xf32>
    %126 = arith.mulf %123, %125 : vector<16x16xf32>
    %c1_80 = arith.constant 1 : index
    %c0_81 = arith.constant 0 : index
    %c0_82 = arith.constant 0 : index
    %c0_83 = arith.constant 0 : index
    %127 = vector.load %arg8[%c1_80, %c0_81, %c0_82, %c0_83] : memref<2x4x16x16xf32, #tpu.memory_space<vmem>>, vector<1x1x16x16xf32>
    %128 = vector.shape_cast %127 : vector<1x1x16x16xf32> to vector<16x16xf32>
    %129 = vector.shape_cast %126 : vector<16x16xf32> to vector<1x1x16x16xf32>
    tpu.vector_store %arg8[%c1_80, %c0_81, %c0_82, %c0_83], %129 {strides = array<i32>} : memref<2x4x16x16xf32, #tpu.memory_space<vmem>>, vector<1x1x16x16xf32>,
    %130 = arith.truncf %126 : vector<16x16xf32> to vector<16x16xbf16>
    %cst_84 = arith.constant dense<0.000000e+00> : vector<8x16xf32>
    %131 = tpu.matmul %112, %130, %cst_84 {dimension_numbers = #tpu.dot_dimension_numbers<[1], [1], [0], [0], [0, 0, 1, 0], [], []>} : vector<8x16xbf16>, vector<16x16xbf16>, vector<8x16xf32> -> vector<8x16xf32>
    %c32 = arith.constant 32 : index
    %c0_85 = arith.constant 0 : index
    %132 = vector.load %arg12[%c32, %c0_85] : memref<64x16xf32, #tpu.memory_space<vmem>>, vector<8x16xf32>
    tpu.vector_store %arg12[%c32, %c0_85], %131 {strides = array<i32>} : memref<64x16xf32, #tpu.memory_space<vmem>>, vector<8x16xf32>,
    %c5 = arith.constant 5 : index
    %c0_86 = arith.constant 0 : index
    %c0_87 = arith.constant 0 : index
    %133 = vector.load %arg9[%c5, %c0_86, %c0_87] : memref<8x8x16xbf16, #tpu.memory_space<vmem>>, vector<1x8x16xbf16>
    %134 = vector.shape_cast %133 : vector<1x8x16xbf16> to vector<8x16xbf16>
    %c5_88 = arith.constant 5 : index
    %c0_89 = arith.constant 0 : index
    %c0_90 = arith.constant 0 : index
    %135 = vector.load %arg10[%c5_88, %c0_89, %c0_90] : memref<8x8x16xbf16, #tpu.memory_space<vmem>>, vector<1x8x16xbf16>
    %136 = vector.shape_cast %135 : vector<1x8x16xbf16> to vector<8x16xbf16>
    %c5_91 = arith.constant 5 : index
    %c0_92 = arith.constant 0 : index
    %c0_93 = arith.constant 0 : index
    %137 = vector.load %arg11[%c5_91, %c0_92, %c0_93] : memref<8x8x16xbf16, #tpu.memory_space<vmem>>, vector<1x8x16xbf16>
    %138 = vector.shape_cast %137 : vector<1x8x16xbf16> to vector<8x16xbf16>
    %cst_94 = arith.constant dense<0.000000e+00> : vector<16x16xf32>
    %139 = tpu.matmul %134, %136, %cst_94 {dimension_numbers = #tpu.dot_dimension_numbers<[0], [0], [1], [1], [0, 1, 1, 1], [], []>} : vector<8x16xbf16>, vector<8x16xbf16>, vector<16x16xf32> -> vector<16x16xf32>
    %cst_95 = arith.constant dense<0xFF800000> : vector<16xf32>
    %140 = vector.multi_reduction <maximumf>, %139, %cst_95 [1] : vector<16x16xf32> to vector<16xf32>
    %141 = vector.shape_cast %140 : vector<16xf32> to vector<16x1xf32>
    %142 = vector.broadcast %141 : vector<16x1xf32> to vector<16x16xf32>
    %143 = arith.subf %139, %142 : vector<16x16xf32>
    %144 = arith.truncf %143 : vector<16x16xf32> to vector<16x16xbf16>
    %145 = math.exp %144 : vector<16x16xbf16>
    %146 = arith.extf %145 : vector<16x16xbf16> to vector<16x16xf32>
    %cst_96 = arith.constant dense<0.000000e+00> : vector<16xf32>
    %147 = vector.multi_reduction <add>, %146, %cst_96 [1] : vector<16x16xf32> to vector<16xf32>
    %148 = vector.shape_cast %147 : vector<16xf32> to vector<16x1xf32>
    %149 = arith.extf %145 : vector<16x16xbf16> to vector<16x16xf32>
    %150 = tpu.reciprocal %148 : vector<16x1xf32> -> vector<16x1xf32>
    %151 = vector.broadcast %150 : vector<16x1xf32> to vector<16x16xf32>
    %152 = arith.mulf %149, %151 : vector<16x16xf32>
    %c1_97 = arith.constant 1 : index
    %c1_98 = arith.constant 1 : index
    %c0_99 = arith.constant 0 : index
    %c0_100 = arith.constant 0 : index
    %153 = vector.load %arg8[%c1_97, %c1_98, %c0_99, %c0_100] : memref<2x4x16x16xf32, #tpu.memory_space<vmem>>, vector<1x1x16x16xf32>
    %154 = vector.shape_cast %153 : vector<1x1x16x16xf32> to vector<16x16xf32>
    %155 = vector.shape_cast %152 : vector<16x16xf32> to vector<1x1x16x16xf32>
    tpu.vector_store %arg8[%c1_97, %c1_98, %c0_99, %c0_100], %155 {strides = array<i32>} : memref<2x4x16x16xf32, #tpu.memory_space<vmem>>, vector<1x1x16x16xf32>,
    %156 = arith.truncf %152 : vector<16x16xf32> to vector<16x16xbf16>
    %cst_101 = arith.constant dense<0.000000e+00> : vector<8x16xf32>
    %157 = tpu.matmul %138, %156, %cst_101 {dimension_numbers = #tpu.dot_dimension_numbers<[1], [1], [0], [0], [0, 0, 1, 0], [], []>} : vector<8x16xbf16>, vector<16x16xbf16>, vector<8x16xf32> -> vector<8x16xf32>
    %c40 = arith.constant 40 : index
    %c0_102 = arith.constant 0 : index
    %158 = vector.load %arg12[%c40, %c0_102] : memref<64x16xf32, #tpu.memory_space<vmem>>, vector<8x16xf32>
    tpu.vector_store %arg12[%c40, %c0_102], %157 {strides = array<i32>} : memref<64x16xf32, #tpu.memory_space<vmem>>, vector<8x16xf32>,
    %c6 = arith.constant 6 : index
    %c0_103 = arith.constant 0 : index
    %c0_104 = arith.constant 0 : index
    %159 = vector.load %arg9[%c6, %c0_103, %c0_104] : memref<8x8x16xbf16, #tpu.memory_space<vmem>>, vector<1x8x16xbf16>
    %160 = vector.shape_cast %159 : vector<1x8x16xbf16> to vector<8x16xbf16>
    %c6_105 = arith.constant 6 : index
    %c0_106 = arith.constant 0 : index
    %c0_107 = arith.constant 0 : index
    %161 = vector.load %arg10[%c6_105, %c0_106, %c0_107] : memref<8x8x16xbf16, #tpu.memory_space<vmem>>, vector<1x8x16xbf16>
    %162 = vector.shape_cast %161 : vector<1x8x16xbf16> to vector<8x16xbf16>
    %c6_108 = arith.constant 6 : index
    %c0_109 = arith.constant 0 : index
    %c0_110 = arith.constant 0 : index
    %163 = vector.load %arg11[%c6_108, %c0_109, %c0_110] : memref<8x8x16xbf16, #tpu.memory_space<vmem>>, vector<1x8x16xbf16>
    %164 = vector.shape_cast %163 : vector<1x8x16xbf16> to vector<8x16xbf16>
    %cst_111 = arith.constant dense<0.000000e+00> : vector<16x16xf32>
    %165 = tpu.matmul %160, %162, %cst_111 {dimension_numbers = #tpu.dot_dimension_numbers<[0], [0], [1], [1], [0, 1, 1, 1], [], []>} : vector<8x16xbf16>, vector<8x16xbf16>, vector<16x16xf32> -> vector<16x16xf32>
    %cst_112 = arith.constant dense<0xFF800000> : vector<16xf32>
    %166 = vector.multi_reduction <maximumf>, %165, %cst_112 [1] : vector<16x16xf32> to vector<16xf32>
    %167 = vector.shape_cast %166 : vector<16xf32> to vector<16x1xf32>
    %168 = vector.broadcast %167 : vector<16x1xf32> to vector<16x16xf32>
    %169 = arith.subf %165, %168 : vector<16x16xf32>
    %170 = arith.truncf %169 : vector<16x16xf32> to vector<16x16xbf16>
    %171 = math.exp %170 : vector<16x16xbf16>
    %172 = arith.extf %171 : vector<16x16xbf16> to vector<16x16xf32>
    %cst_113 = arith.constant dense<0.000000e+00> : vector<16xf32>
    %173 = vector.multi_reduction <add>, %172, %cst_113 [1] : vector<16x16xf32> to vector<16xf32>
    %174 = vector.shape_cast %173 : vector<16xf32> to vector<16x1xf32>
    %175 = arith.extf %171 : vector<16x16xbf16> to vector<16x16xf32>
    %176 = tpu.reciprocal %174 : vector<16x1xf32> -> vector<16x1xf32>
    %177 = vector.broadcast %176 : vector<16x1xf32> to vector<16x16xf32>
    %178 = arith.mulf %175, %177 : vector<16x16xf32>
    %c1_114 = arith.constant 1 : index
    %c2_115 = arith.constant 2 : index
    %c0_116 = arith.constant 0 : index
    %c0_117 = arith.constant 0 : index
    %179 = vector.load %arg8[%c1_114, %c2_115, %c0_116, %c0_117] : memref<2x4x16x16xf32, #tpu.memory_space<vmem>>, vector<1x1x16x16xf32>
    %180 = vector.shape_cast %179 : vector<1x1x16x16xf32> to vector<16x16xf32>
    %181 = vector.shape_cast %178 : vector<16x16xf32> to vector<1x1x16x16xf32>
    tpu.vector_store %arg8[%c1_114, %c2_115, %c0_116, %c0_117], %181 {strides = array<i32>} : memref<2x4x16x16xf32, #tpu.memory_space<vmem>>, vector<1x1x16x16xf32>,
    %182 = arith.truncf %178 : vector<16x16xf32> to vector<16x16xbf16>
    %cst_118 = arith.constant dense<0.000000e+00> : vector<8x16xf32>
    %183 = tpu.matmul %164, %182, %cst_118 {dimension_numbers = #tpu.dot_dimension_numbers<[1], [1], [0], [0], [0, 0, 1, 0], [], []>} : vector<8x16xbf16>, vector<16x16xbf16>, vector<8x16xf32> -> vector<8x16xf32>
    %c48 = arith.constant 48 : index
    %c0_119 = arith.constant 0 : index
    %184 = vector.load %arg12[%c48, %c0_119] : memref<64x16xf32, #tpu.memory_space<vmem>>, vector<8x16xf32>
    tpu.vector_store %arg12[%c48, %c0_119], %183 {strides = array<i32>} : memref<64x16xf32, #tpu.memory_space<vmem>>, vector<8x16xf32>,
    %c7 = arith.constant 7 : index
    %c0_120 = arith.constant 0 : index
    %c0_121 = arith.constant 0 : index
    %185 = vector.load %arg9[%c7, %c0_120, %c0_121] : memref<8x8x16xbf16, #tpu.memory_space<vmem>>, vector<1x8x16xbf16>
    %186 = vector.shape_cast %185 : vector<1x8x16xbf16> to vector<8x16xbf16>
    %c7_122 = arith.constant 7 : index
    %c0_123 = arith.constant 0 : index
    %c0_124 = arith.constant 0 : index
    %187 = vector.load %arg10[%c7_122, %c0_123, %c0_124] : memref<8x8x16xbf16, #tpu.memory_space<vmem>>, vector<1x8x16xbf16>
    %188 = vector.shape_cast %187 : vector<1x8x16xbf16> to vector<8x16xbf16>
    %c7_125 = arith.constant 7 : index
    %c0_126 = arith.constant 0 : index
    %c0_127 = arith.constant 0 : index
    %189 = vector.load %arg11[%c7_125, %c0_126, %c0_127] : memref<8x8x16xbf16, #tpu.memory_space<vmem>>, vector<1x8x16xbf16>
    %190 = vector.shape_cast %189 : vector<1x8x16xbf16> to vector<8x16xbf16>
    %cst_128 = arith.constant dense<0.000000e+00> : vector<16x16xf32>
    %191 = tpu.matmul %186, %188, %cst_128 {dimension_numbers = #tpu.dot_dimension_numbers<[0], [0], [1], [1], [0, 1, 1, 1], [], []>} : vector<8x16xbf16>, vector<8x16xbf16>, vector<16x16xf32> -> vector<16x16xf32>
    %cst_129 = arith.constant dense<0xFF800000> : vector<16xf32>
    %192 = vector.multi_reduction <maximumf>, %191, %cst_129 [1] : vector<16x16xf32> to vector<16xf32>
    %193 = vector.shape_cast %192 : vector<16xf32> to vector<16x1xf32>
    %194 = vector.broadcast %193 : vector<16x1xf32> to vector<16x16xf32>
    %195 = arith.subf %191, %194 : vector<16x16xf32>
    %196 = arith.truncf %195 : vector<16x16xf32> to vector<16x16xbf16>
    %197 = math.exp %196 : vector<16x16xbf16>
    %198 = arith.extf %197 : vector<16x16xbf16> to vector<16x16xf32>
    %cst_130 = arith.constant dense<0.000000e+00> : vector<16xf32>
    %199 = vector.multi_reduction <add>, %198, %cst_130 [1] : vector<16x16xf32> to vector<16xf32>
    %200 = vector.shape_cast %199 : vector<16xf32> to vector<16x1xf32>
    %201 = arith.extf %197 : vector<16x16xbf16> to vector<16x16xf32>
    %202 = tpu.reciprocal %200 : vector<16x1xf32> -> vector<16x1xf32>
    %203 = vector.broadcast %202 : vector<16x1xf32> to vector<16x16xf32>
    %204 = arith.mulf %201, %203 : vector<16x16xf32>
    %c1_131 = arith.constant 1 : index
    %c3_132 = arith.constant 3 : index
    %c0_133 = arith.constant 0 : index
    %c0_134 = arith.constant 0 : index
    %205 = vector.load %arg8[%c1_131, %c3_132, %c0_133, %c0_134] : memref<2x4x16x16xf32, #tpu.memory_space<vmem>>, vector<1x1x16x16xf32>
    %206 = vector.shape_cast %205 : vector<1x1x16x16xf32> to vector<16x16xf32>
    %207 = vector.shape_cast %204 : vector<16x16xf32> to vector<1x1x16x16xf32>
    tpu.vector_store %arg8[%c1_131, %c3_132, %c0_133, %c0_134], %207 {strides = array<i32>} : memref<2x4x16x16xf32, #tpu.memory_space<vmem>>, vector<1x1x16x16xf32>,
    %208 = arith.truncf %204 : vector<16x16xf32> to vector<16x16xbf16>
    %cst_135 = arith.constant dense<0.000000e+00> : vector<8x16xf32>
    %209 = tpu.matmul %190, %208, %cst_135 {dimension_numbers = #tpu.dot_dimension_numbers<[1], [1], [0], [0], [0, 0, 1, 0], [], []>} : vector<8x16xbf16>, vector<16x16xbf16>, vector<8x16xf32> -> vector<8x16xf32>
    %c56 = arith.constant 56 : index
    %c0_136 = arith.constant 0 : index
    %210 = vector.load %arg12[%c56, %c0_136] : memref<64x16xf32, #tpu.memory_space<vmem>>, vector<8x16xf32>
    tpu.vector_store %arg12[%c56, %c0_136], %209 {strides = array<i32>} : memref<64x16xf32, #tpu.memory_space<vmem>>, vector<8x16xf32>,
    %c0_i32_137 = arith.constant 0 : i32
    %211 = arith.cmpi eq, %arg1, %c0_i32_137 : i32
    %212 = arith.extui %211 : i1 to i32
    %c0_i32_138 = arith.constant 0 : i32
    %213 = arith.cmpi ne, %212, %c0_i32_138 : i32
    scf.if %213 {
      %c0_139 = arith.constant 0 : index
      %c0_140 = arith.constant 0 : index
      %214 = vector.load %arg12[%c0_139, %c0_140] : memref<64x16xf32, #tpu.memory_space<vmem>>, vector<32x16xf32>
      %215 = arith.truncf %214 : vector<32x16xf32> to vector<32x16xbf16>
      %c0_141 = arith.constant 0 : index
      %c0_142 = arith.constant 0 : index
      %216 = vector.load %arg5[%c0_141, %c0_142] : memref<4x32xbf16, #tpu.memory_space<vmem>>, vector<4x32xbf16>
      %cst_143 = arith.constant dense<0.000000e+00> : vector<4x16xf32>
      %217 = tpu.matmul %216, %215, %cst_143 {dimension_numbers = #tpu.dot_dimension_numbers<[1], [0], [0], [1], [0, 0, 1, 1], [], []>} : vector<4x32xbf16>, vector<32x16xbf16>, vector<4x16xf32> -> vector<4x16xf32>
      %c0_144 = arith.constant 0 : index
      %c0_145 = arith.constant 0 : index
      %218 = vector.load %arg6[%c0_144, %c0_145] : memref<4x1xf32, #tpu.memory_space<vmem>>, vector<4x1xf32>
      %219 = vector.broadcast %218 : vector<4x1xf32> to vector<4x16xf32>
      %220 = arith.addf %217, %219 : vector<4x16xf32>
      %c0_146 = arith.constant 0 : index
      %c0_147 = arith.constant 0 : index
      %c0_148 = arith.constant 0 : index
      %221 = vector.load %arg7[%c0_146, %c0_147, %c0_148] : memref<2x4x16xf32, #tpu.memory_space<vmem>>, vector<1x4x16xf32>
      %222 = vector.shape_cast %221 : vector<1x4x16xf32> to vector<4x16xf32>
      %223 = vector.shape_cast %220 : vector<4x16xf32> to vector<1x4x16xf32>
      tpu.vector_store %arg7[%c0_146, %c0_147, %c0_148], %223 {strides = array<i32>} : memref<2x4x16xf32, #tpu.memory_space<vmem>>, vector<1x4x16xf32>,
      %c32_149 = arith.constant 32 : index
      %c0_150 = arith.constant 0 : index
      %224 = vector.load %arg12[%c32_149, %c0_150] : memref<64x16xf32, #tpu.memory_space<vmem>>, vector<32x16xf32>
      %225 = arith.truncf %224 : vector<32x16xf32> to vector<32x16xbf16>
      %c0_151 = arith.constant 0 : index
      %c0_152 = arith.constant 0 : index
      %226 = vector.load %arg5[%c0_151, %c0_152] : memref<4x32xbf16, #tpu.memory_space<vmem>>, vector<4x32xbf16>
      %cst_153 = arith.constant dense<0.000000e+00> : vector<4x16xf32>
      %227 = tpu.matmul %226, %225, %cst_153 {dimension_numbers = #tpu.dot_dimension_numbers<[1], [0], [0], [1], [0, 0, 1, 1], [], []>} : vector<4x32xbf16>, vector<32x16xbf16>, vector<4x16xf32> -> vector<4x16xf32>
      %c0_154 = arith.constant 0 : index
      %c0_155 = arith.constant 0 : index
      %228 = vector.load %arg6[%c0_154, %c0_155] : memref<4x1xf32, #tpu.memory_space<vmem>>, vector<4x1xf32>
      %229 = vector.broadcast %228 : vector<4x1xf32> to vector<4x16xf32>
      %230 = arith.addf %227, %229 : vector<4x16xf32>
      %c1_156 = arith.constant 1 : index
      %c0_157 = arith.constant 0 : index
      %c0_158 = arith.constant 0 : index
      %231 = vector.load %arg7[%c1_156, %c0_157, %c0_158] : memref<2x4x16xf32, #tpu.memory_space<vmem>>, vector<1x4x16xf32>
      %232 = vector.shape_cast %231 : vector<1x4x16xf32> to vector<4x16xf32>
      %233 = vector.shape_cast %230 : vector<4x16xf32> to vector<1x4x16xf32>
      tpu.vector_store %arg7[%c1_156, %c0_157, %c0_158], %233 {strides = array<i32>} : memref<2x4x16xf32, #tpu.memory_space<vmem>>, vector<1x4x16xf32>,
    } else {
    }
    return
  }
  func.func @transform_0(%arg0: i32, %arg1: i32) -> (i32, i32, i32) {
    %c0_i32 = arith.constant 0 : i32
    %c0_i32_0 = arith.constant 0 : i32
    %c0_i32_1 = arith.constant 0 : i32
    return %arg0, %c0_i32, %c0_i32_0 : i32, i32, i32
  }
  func.func @transform_1(%arg0: i32, %arg1: i32) -> (i32, i32) {
    %c0_i32 = arith.constant 0 : i32
    %c0_i32_0 = arith.constant 0 : i32
    %c0_i32_1 = arith.constant 0 : i32
    return %c0_i32, %c0_i32_0 : i32, i32
  }
  func.func @transform_2(%arg0: i32, %arg1: i32) -> (i32, i32) {
    %c0_i32 = arith.constant 0 : i32
    %c0_i32_0 = arith.constant 0 : i32
    %c0_i32_1 = arith.constant 0 : i32
    return %c0_i32, %c0_i32_0 : i32, i32
  }
  func.func @transform_3(%arg0: i32, %arg1: i32) -> (i32, i32) {
    %c0_i32 = arith.constant 0 : i32
    %c0_i32_0 = arith.constant 0 : i32
    %c0_i32_1 = arith.constant 0 : i32
    return %c0_i32, %c0_i32_0 : i32, i32
  }
  func.func @transform_4(%arg0: i32, %arg1: i32) -> (i32, i32) {
    %c0_i32 = arith.constant 0 : i32
    %c0_i32_0 = arith.constant 0 : i32
    %c0_i32_1 = arith.constant 0 : i32
    return %c0_i32, %c0_i32_0 : i32, i32
  }
  func.func @transform_5(%arg0: i32, %arg1: i32) -> (i32, i32, i32) {
    %c0_i32 = arith.constant 0 : i32
    %c0_i32_0 = arith.constant 0 : i32
    %c0_i32_1 = arith.constant 0 : i32
    return %arg0, %c0_i32, %c0_i32_0 : i32, i32, i32
  }
  func.func @transform_6(%arg0: i32, %arg1: i32) -> (i32, i32, i32, i32) {
    %c0_i32 = arith.constant 0 : i32
    %c0_i32_0 = arith.constant 0 : i32
    %c0_i32_1 = arith.constant 0 : i32
    return %arg0, %arg1, %c0_i32, %c0_i32_0 : i32, i32, i32, i32
  }
}

</mosaic_0001>

<bundles_post_ra>
// kernel: tpu_custom_call.1
= control target key start
LH: loop header
LB: loop body
LE: loop exit
PB: predicated region body
PF: predicated region fallthrough
CT: control target
= control target key end

     0   :  { %12 = vsyncpa [#allocation7], 0  ;;  %vm169_vm0 = vcmask 1045504   ;;  %vm150_vm1 = vcmask 97280   ;;  %v2212_v8 = vmov 0   ;;  %s2758_s0 = inlined_call_operand.vmem [shape: bf16[2,12,16], index: 0, kind: input, shape index: {}]   ;;  %s2759_s1 = inlined_call_operand.vmem [shape: bf16[96,12], index: 1, kind: input, shape index: {}]   ;;  %s2760_s2 = inlined_call_operand.vmem [shape: f32[96,1], index: 2, kind: input, shape index: {}]   ;;  %s2761_s3 = inlined_call_operand.vmem [shape: bf16[4,32], index: 3, kind: input, shape index: {}]   ;;  %s2762_s4 = inlined_call_operand.vmem [shape: f32[4,1], index: 4, kind: input, shape index: {}]   ;;  %s2763_s5 = inlined_call_operand.hbm [shape: f32[2,4,16], index: 5, kind: output, shape index: {0}]   ;;  %s2764_s6 = inlined_call_operand.hbm [shape: f32[2,4,16,16], index: 6, kind: output, shape index: {1}]  }
   0x1   :  { %v2102_v0 = vld [vmem:[%s2758_s0] sm:$0x3f]   ;;  %v2103_v2 = vld [vmem:[%s2758_s0 + $0x8] sm:$0x3f]   ;;  %2100 = vset.pattern.permute.xlu0 %v2212_v8  ;;  %v2108_v9 = vld [vmem:[%s2759_s1 + $0x10] sm:$0xff]   ;;  %2101 = vset.pattern.permute.xlu1 %v2212_v8 }
   0x2   :  { %v2104_v1 = vld [vmem:[%s2759_s1] sm:$0xff]   ;;  %2089 = vmatprep.subr.msk.bf16.mxu0 %vm169_vm0, %v2102_v0  ;;  %v171_v3 = vsel %vm169_vm0, %v2102_v0, 0  ;;  %2090 = vmatprep.subr.msk.bf16.mxu1 %vm169_vm0, %v2103_v2  ;;  %v429_v4 = vsel %vm169_vm0, %v2103_v2, 0  ;;  %v2106_v6 = vld [vmem:[%s2759_s1 + $0x8] sm:$0xff]   ;;  %v2110_v10 = vld [vmem:[%s2759_s1 + $0x10] sm:$0xff]  }
   0x3   :  { %1950 = vmatpush3.bf16.msra.mxu0 %v171_v3  ;;  %1951 = vmatprep.mubr.msk.bf16.mxu0 %vm150_vm1, %v2104_v1  ;;  %v2105_v5 = vld [vmem:[%s2759_s1] sm:$0xff]   ;;  %v2107_v7 = vld [vmem:[%s2759_s1 + $0x8] sm:$0xff]   ;;  %v2111_v12 = vld [vmem:[%s2759_s1 + $0x18] sm:$0xff]  }
   0x4   :  { %1964 = vmatpush3.bf16.msra.mxu1 %v429_v4  ;;  %1965 = vmatprep.mubr.msk.bf16.mxu1 %vm150_vm1, %v2105_v5  ;;  %v43_v11 = vld [vmem:[%s2760_s2] sm:$0xff]  ;;  %v305_v13 = vld [vmem:[%s2760_s2 + $0x10] sm:$0xff]  ;;  %v2109_v14 = vld [vmem:[%s2759_s1 + $0x18] sm:$0xff]  }
   0x5   :  { %57 = vperm.xlu0 %2100, %v43_v11   ;;  %v44_v15 = vld [vmem:[%s2760_s2 + $0x8] sm:$0xff]  ;;  %67 = vperm.xlu1 %2101, %v305_v13   ;;  %v2112_v16 = vld [vmem:[%s2759_s1 + $0x20] sm:$0xff]   ;;  %v306_v17 = vld [vmem:[%s2760_s2 + $0x18] sm:$0xff] }
   0x6   :  { %1952 = vmatmul.mubr.msk.bf16.vlgmr.msra.gmra.mrb[0].mxu0 %vm150_vm1, %v2106_v6 }
   0x7   :  { %1966 = vmatmul.mubr.msk.bf16.vlgmr.msra.gmra.mrb[0].mxu1 %vm150_vm1, %v2107_v7  ;;  %1955 = vmatprep.mubr.msk.bf16.mxu0 %vm150_vm1, %v2110_v10 }
   0x8   :  { %1969 = vmatprep.mubr.msk.bf16.mxu1 %vm150_vm1, %v2108_v9 }
   0x9   :  { %62 = vperm.xlu0 %2100, %v44_v15   ;;  %72 = vperm.xlu1 %2101, %v306_v17  }
   0xe   :  { %1956 = vmatmul.mubr.msk.bf16.gmra.mrb[4].mxu0 %vm150_vm1, %v2111_v12 }
   0xf   :  { %1970 = vmatmul.mubr.msk.bf16.gmra.mrb[4].mxu1 %vm150_vm1, %v2109_v14 }
  0x10   :  { %13 = vsyncpa [#allocation9], 0  ;;  %1959 = vmatprep.mubr.msk.bf16.mxu0 %vm150_vm1, %v2112_v16  ;;  %317 = vperm.xlu0 %2100, %v43_v11   ;;  %v307_v18 = vld [vmem:[%s2760_s2 + $0x20] sm:$0xff]  ;;  %v2113_v19 = vld [vmem:[%s2759_s1 + $0x28] sm:$0xff]   ;;  %v2213_v23 = vmov 0.0   ;;  %vm2214_vm2 = vmmov 0  }
  0x11   :  { %77 = vperm.xlu1 %2101, %v307_v18   ;;  %v48_v20 = vld [vmem:[%s2760_s2 + $0x28] sm:$0xff]  ;;  %v49_v21 = vld [vmem:[%s2760_s2 + $0x30] sm:$0xff]  ;;  %v2326_v22 = vld [vmem:[%s2760_s2 + $0x38] sm:$0xff]  ;;  %1977 = vmatprep.subr.bf16.mxu0 %v2213_v23  ;;  %vm255_vm3 = vcmask 125952   ;;  %vm571_vm4 = vcmask 1043456   ;;  %vm567_vm5 = vcmask 64512  }
  0x12   :  { %1983 = vmatprep.subr.bf16.mxu1 %v2213_v23  ;;  %vm616_vm6 = vcmask 130048   ;;  %vm1715_vm7 = vcmask 261120   ;;  %s2215_s28 = smov [#allocation8]  }
  0x13   :  { %s1836_s29 = sshll.u32 %s2215_s28, 4  ;;  %s1837_s29 = int_to_ptr.vmem [resolvable:$true] %s1836_s29 }
  0x14   :  { %322 = vperm.xlu0 %2100, %v44_v15   ;;  %s2164_s30 = scalar_lea.vmem %s1837_s29, 2048  ;;  %p2169_p1 = scmp.lt.s32.totalorder %s1837_s29, %s1837_s29 }
  0x15   :  { %82 = vperm.xlu1 %2101, %v48_v20   ;;  %p2165_p0 = scmp.ne.s32.totalorder %s1837_s29, %s2164_s30  ;;  %p2170_p2 = scmp.lt.s32.totalorder %s2164_s30, %s2164_s30 }
  0x16   :  { %1960 = vmatmul.mubr.msk.bf16.gmra.mrb[8].mxu0 %vm150_vm1, %v2113_v19 }
  0x17   :  { %1979 = vmatprep.mubr.msk.bf16.mxu0 %vm2214_vm2, %v2213_v23  ;;  %p2171_p3 = por %p2170_p2, %p2169_p1 }
  0x18   :  { %327 = vperm.xlu0 %2100, %v305_v13  }
  0x19   :  { %87 = vperm.xlu1 %2101, %v49_v21   ;;  %p2172_p4 = pnand %p2171_p3, %p2165_p0 }
  0x1c   :  { %332 = vperm.xlu0 %2100, %v306_v17  }
  0x1d   :  { %92 = vperm.xlu1 %2101, %v2326_v22  }
  0x20   :  { %337 = vperm.xlu0 %2100, %v307_v18  }
  0x21   :  { %342 = vperm.xlu1 %2101, %v48_v20  }
  0x25   :  { %347 = vperm.xlu1 %2101, %v49_v21  }
  0x84   :  { %v68_v24 = vpop.permute.xlu1 %67  ;;  %v58_v25 = vpop.permute.xlu0 %57 }
  0x88   :  { %v73_v26 = vpop.permute.xlu1 %72  ;;  %v63_v27 = vpop.permute.xlu0 %62 }
  0x8f   :  { %v318_v29 = vpop.permute.xlu0 %317 }
  0x90   :  { %v78_v28 = vpop.permute.xlu1 %77 }
  0x93   :  { %v323_v31 = vpop.permute.xlu0 %322 }
  0x94   :  { %v83_v30 = vpop.permute.xlu1 %82 }
  0x97   :  { %v328_v33 = vpop.permute.xlu0 %327 }
  0x98   :  { %v88_v32 = vpop.permute.xlu1 %87 }
  0x9b   :  { %v333_v35 = vpop.permute.xlu0 %332 }
  0x9c   :  { %v93_v34 = vpop.permute.xlu1 %92 }
  0x9f   :  { %v338_v62 = vpop.permute.xlu0 %337 }
  0xa0   :  { %v343_v37 = vpop.permute.xlu1 %342 }
  0xa4   :  { %v348_v61 = vpop.permute.xlu1 %347 }
  0xd9   :  { %v1953_v36 = vpop.f32.mrb[0].mxu0 }
  0xda   :  { %v216_v38 = vadd.f32 %v1953_v36, %v68_v24  ;;  %v1967_v39 = vpop.f32.mrb[0].mxu1  ;;  %v207_v40 = vpop.f32.mrb[1].mxu0 }
  0xdb   :  { %v474_v41 = vadd.f32 %v1967_v39, %v328_v33  ;;  %v465_v42 = vpop.f32.mrb[1].mxu1  ;;  %v208_v43 = vadd.f32 %v207_v40, %v58_v25  ;;  %v1954_v44 = vpop.f32.mrb[2].mxu0 }
  0xdc   :  { %v260_v45 = vpack.c.bf16 %v216_v38, %v216_v38  ;;  %v466_v46 = vadd.f32 %v465_v42, %v318_v29  ;;  %v1968_v47 = vpop.f32.mrb[2].mxu1  ;;  %v219_v48 = vadd.f32 %v1954_v44, %v73_v26  ;;  %v210_v49 = vpop.f32.mrb[3].mxu0 }
  0xdd   :  { %v518_v50 = vpack.c.bf16 %v474_v41, %v474_v41  ;;  %v254_v51 = vpack.c.bf16 %v208_v43, %v208_v43  ;;  %v477_v52 = vadd.f32 %v1968_v47, %v333_v35  ;;  %v211_v53 = vadd.f32 %v210_v49, %v63_v27  ;;  %v468_v54 = vpop.f32.mrb[3].mxu1 }
  0xde   :  { %262 = vst.msk [vmem:[#allocation2 + $0x8] sm:$0xf] %vm255_vm3, %v260_v45  ;;  %v512_v55 = vpack.c.bf16 %v466_v46, %v466_v46  ;;  %v263_v56 = vpack.c.bf16 %v219_v48, %v219_v48  ;;  %v469_v57 = vadd.f32 %v468_v54, %v323_v31 }
  0xdf   :  { %520 = vst.msk [vmem:[#allocation2 + $0x18] sm:$0xf] %vm255_vm3, %v518_v50  ;;  %256 = vst.msk [vmem:[#allocation2] sm:$0xf] %vm255_vm3, %v254_v51  ;;  %v521_v58 = vpack.c.bf16 %v477_v52, %v477_v52  ;;  %v257_v59 = vpack.c.bf16 %v211_v53, %v211_v53 }
  0xe0   :  { %514 = vst.msk [vmem:[#allocation2 + $0x10] sm:$0xf] %vm255_vm3, %v512_v55  ;;  %265 = vst.msk [vmem:[#allocation2 + $0xc] sm:$0xf] %vm255_vm3, %v263_v56  ;;  %v515_v60 = vpack.c.bf16 %v469_v57, %v469_v57 }
  0xe1   :  { %523 = vst.msk [vmem:[#allocation2 + $0x1c] sm:$0xf] %vm255_vm3, %v521_v58  ;;  %259 = vst.msk [vmem:[#allocation2 + $0x4] sm:$0xf] %vm255_vm3, %v257_v59  ;;  %v1957_v63 = vpop.f32.mrb[4].mxu0 }
  0xe2   :  { %517 = vst.msk [vmem:[#allocation2 + $0x14] sm:$0xf] %vm255_vm3, %v515_v60  ;;  %v1971_v0 = vpop.f32.mrb[4].mxu1  ;;  %v232_v1 = vadd.f32 %v1957_v63, %v88_v32  ;;  %v223_v2 = vpop.f32.mrb[5].mxu0  ;;  %v2356_v32 = vld [vmem:[%s2760_s2 + $0x40] sm:$0xff] }
  0xe3   :  { %v481_v3 = vpop.f32.mrb[5].mxu1  ;;  %v224_v4 = vadd.f32 %v223_v2, %v78_v28  ;;  %v1958_v5 = vpop.f32.mrb[6].mxu0  ;;  %v490_v6 = vadd.f32 %v1971_v0, %v348_v61  ;;  %v2115_v2 = vld [vmem:[%s2759_s1 + $0x28] sm:$0xff]  }
  0xe4   :  { %v482_v7 = vadd.f32 %v481_v3, %v338_v62  ;;  %v271_v8 = vpack.c.bf16 %v232_v1, %v232_v1  ;;  %v235_v9 = vadd.f32 %v1958_v5, %v93_v34  ;;  %v2341_v10 = vpop.f32.mrb[6].mxu1  ;;  %v226_v11 = vpop.f32.mrb[7].mxu0  ;;  %v2114_v1 = vld [vmem:[%s2759_s1 + $0x20] sm:$0xff]  }
  0xe5   :  { %v266_v12 = vpack.c.bf16 %v224_v4, %v224_v4  ;;  %v484_v13 = vpop.f32.mrb[7].mxu1  ;;  %v530_v14 = vpack.c.bf16 %v490_v6, %v490_v6  ;;  %v227_v15 = vadd.f32 %v226_v11, %v83_v30  ;;  %1973 = vmatprep.mubr.msk.bf16.mxu1 %vm150_vm1, %v2114_v1 }
  0xe6   :  { %v524_v16 = vpack.c.bf16 %v482_v7, %v482_v7  ;;  %v548_v17 = vld [vmem:[#allocation2] sm:$0xf]  ;;  %273 = vst.msk [vmem:[#allocation3 + $0x8] sm:$0xf] %vm255_vm3, %v271_v8  ;;  %v274_v18 = vpack.c.bf16 %v235_v9, %v235_v9  ;;  %v485_v19 = vadd.f32 %v484_v13, %v343_v37  ;;  %v1412_v30 = vld [vmem:[#allocation2 + $0x18] sm:$0xf]  ;;  %1974 = vmatmul.mubr.msk.bf16.gmra.mrb[8].mxu1 %vm150_vm1, %v2115_v2 }
  0xe7   :  { %551 = vxpose.xlu0.c.b16.start.end [1/1] (short) (narrow) %v548_v17, 16  ;;  %267 = vst.msk [vmem:[#allocation3] sm:$0xf] %vm255_vm3, %v266_v12  ;;  %532 = vst.msk [vmem:[#allocation3 + $0x18] sm:$0xf] %vm255_vm3, %v530_v14  ;;  %v268_v20 = vpack.c.bf16 %v227_v15, %v227_v15  ;;  %1985 = vmatprep.mubr.msk.bf16.mxu1 %vm2214_vm2, %v2213_v23 }
  0xe8   :  { %526 = vst.msk [vmem:[#allocation3 + $0x10] sm:$0xf] %vm255_vm3, %v524_v16  ;;  %v692_v21 = vld [vmem:[#allocation2 + $0x4] sm:$0xf]  ;;  %276 = vst.msk [vmem:[#allocation3 + $0xc] sm:$0xf] %vm255_vm3, %v274_v18  ;;  %v527_v24 = vpack.c.bf16 %v485_v19, %v485_v19 }
  0xe9   :  { %697 = vxpose.xlu1.c.b16.start.end [1/1] (short) (narrow) %v692_v21, 16  ;;  %270 = vst.msk [vmem:[#allocation3 + $0x4] sm:$0xf] %vm255_vm3, %v268_v20  ;;  %v980_v25 = vld [vmem:[#allocation2 + $0xc] sm:$0xf]  ;;  %v2358_v33 = vpop.f32.mrb[8].mxu0 }
  0xea   :  { %529 = vst.msk [vmem:[#allocation3 + $0x14] sm:$0xf] %vm255_vm3, %v527_v24  ;;  %v1124_v28 = vld [vmem:[#allocation2 + $0x10] sm:$0xf]  ;;  %v1268_v29 = vld [vmem:[#allocation2 + $0x14] sm:$0xf] }
  0xeb   :  { %v1556_v31 = vld [vmem:[#allocation2 + $0x1c] sm:$0xf]  ;;  %v239_v34 = vpop.f32.mrb[9].mxu0 }
  0xec   :  { %v2361_v35 = vpop.f32.mrb[10].mxu0 }
  0xed   :  { %985 = vxpose.xlu1.c.b16.start.end [1/1] (short) (narrow) %v980_v25, 16  ;;  %v2363_v36 = vpop.f32.mrb[11].mxu0  ;;  %v838_v41 = vld [vmem:[#allocation3 + $0x8] sm:$0xf] }
  0xee   :  { %v549_v26 = vld [vmem:[#allocation3] sm:$0xf]  ;;  %v861_v42 = vsel %vm571_vm4, %v838_v41, 0  ;;  %v1414_v61 = vld [vmem:[#allocation3 + $0x18] sm:$0xf] }
  0xef   :  { %v573_v27 = vsel %vm571_vm4, %v549_v26, 0  ;;  %v982_v49 = vld [vmem:[#allocation3 + $0xc] sm:$0xf]  ;;  %v1126_v54 = vld [vmem:[#allocation3 + $0x10] sm:$0xf]  ;;  %v1437_v62 = vsel %vm571_vm4, %v1414_v61, 0 }
  0xf0   :  { %352 = vperm.xlu0 %2100, %v2326_v22   ;;  %1978 = vmatpush3.bf16.msra.mxu0 %v573_v27  ;;  %v836_v22 = vld [vmem:[#allocation2 + $0x8] sm:$0xf]  ;;  %v694_v37 = vld [vmem:[#allocation3 + $0x4] sm:$0xf]  ;;  %v1005_v52 = vsel %vm571_vm4, %v982_v49, 0  ;;  %v1149_v55 = vsel %vm571_vm4, %v1126_v54, 0 }
  0xf1   :  { %1129 = vxpose.xlu1.c.b16.start.end [1/1] (short) (narrow) %v1124_v28, 16  ;;  %1989 = vmatprep.subr.bf16.mxu0 %v2213_v23  ;;  %v717_v39 = vsel %vm571_vm4, %v694_v37, 0  ;;  %v1270_v58 = vld [vmem:[#allocation3 + $0x14] sm:$0xf] }
  0xf2   :  { %v1293_v60 = vsel %vm571_vm4, %v1270_v58, 0  ;;  %v2447_v27 = vld [vmem:[%s2760_s2 + $0x50] sm:$0xff]  ;;  %v2495_v58 = vld [vmem:[%s2760_s2 + $0x58] sm:$0xff] }
  0xf5   :  { %1273 = vxpose.xlu1.c.b16.start.end [1/1] (short) (narrow) %v1268_v29, 16 }
  0xf9   :  { %1417 = vxpose.xlu1.c.b16.start.end [1/1] (short) (narrow) %v1412_v30, 16 }
  0xfd   :  { %1561 = vxpose.xlu1.c.b16.start.end [1/1] (short) (narrow) %v1556_v31, 16 }
 0x101   :  { %97 = vperm.xlu1 %2101, %v2356_v32  }
 0x10e   :  { %841 = vxpose.xlu0.c.b16.start.end [1/1] (short) (narrow) %v836_v22, 16 }
 0x14d   :  { %v559_v38 = vpop.trf.xlu0 }
 0x14e   :  { %1980 = vmatmul.mubr.msk.bf16.vlgmr.msra.gmra.mrb[12].mxu0 %vm567_vm5, %v559_v38 }
 0x14f   :  { %1990 = vmatpush3.bf16.msra.mxu0 %v717_v39  ;;  %1991 = vmatprep.mubr.msk.bf16.mxu0 %vm2214_vm2, %v2213_v23  ;;  %v705_v40 = vpop.trf.xlu1 }
 0x150   :  { %2001 = vmatprep.subr.bf16.mxu0 %v2213_v23 }
 0x153   :  { %v993_v43 = vpop.trf.xlu1 }
 0x156   :  { %1992 = vmatmul.mubr.msk.bf16.vlgmr.msra.gmra.mrb[16].mxu0 %vm567_vm5, %v705_v40 }
 0x157   :  { %2002 = vmatpush3.bf16.msra.mxu0 %v861_v42  ;;  %2003 = vmatprep.mubr.msk.bf16.mxu0 %vm2214_vm2, %v2213_v23  ;;  %v1137_v44 = vpop.trf.xlu1 }
 0x158   :  { %2013 = vmatprep.subr.bf16.mxu0 %v2213_v23 }
 0x15b   :  { %v1281_v45 = vpop.trf.xlu1 }
 0x15f   :  { %v1425_v51 = vpop.trf.xlu1 }
 0x163   :  { %v1569_v53 = vpop.trf.xlu1 }
 0x16f   :  { %v353_v46 = vpop.permute.xlu0 %352 }
 0x170   :  { %v493_v47 = vadd.f32 %v2341_v10, %v353_v46 }
 0x172   :  { %v533_v48 = vpack.c.bf16 %v493_v47, %v493_v47 }
 0x174   :  { %535 = vst.msk [vmem:[#allocation3 + $0x1c] sm:$0xf] %vm255_vm3, %v533_v48  ;;  %v849_v50 = vpop.trf.xlu0 }
 0x175   :  { %2004 = vmatmul.mubr.msk.bf16.vlgmr.msra.gmra.mrb[20].mxu0 %vm567_vm5, %v849_v50 }
 0x176   :  { %2014 = vmatpush3.bf16.msra.mxu0 %v1005_v52  ;;  %2015 = vmatprep.mubr.msk.bf16.mxu0 %vm2214_vm2, %v2213_v23 }
 0x177   :  { %2025 = vmatprep.subr.bf16.mxu0 %v2213_v23 }
 0x17b   :  { %v1558_v63 = vld [vmem:[#allocation3 + $0x1c] sm:$0xf] }
 0x17c   :  { %v1581_v0 = vsel %vm571_vm4, %v1558_v63, 0 }
 0x17d   :  { %2016 = vmatmul.mubr.msk.bf16.vlgmr.msra.gmra.mrb[24].mxu0 %vm567_vm5, %v993_v43 }
 0x17e   :  { %2026 = vmatpush3.bf16.msra.mxu0 %v1149_v55  ;;  %2027 = vmatprep.mubr.msk.bf16.mxu0 %vm2214_vm2, %v2213_v23 }
 0x17f   :  { %2037 = vmatprep.subr.bf16.mxu0 %v2213_v23 }
 0x180   :  { %v98_v56 = vpop.permute.xlu1 %97 }
 0x181   :  { %v240_v57 = vadd.f32 %v239_v34, %v98_v56  ;;  %v2457_v34 = vld [vmem:[%s2760_s2 + $0x48] sm:$0xff] }
 0x183   :  { %v277_v59 = vpack.c.bf16 %v240_v57, %v240_v57 }
 0x185   :  { %278 = vst.msk [vmem:[#allocation4] sm:$0xf] %vm255_vm3, %v277_v59  ;;  %2028 = vmatmul.mubr.msk.bf16.vlgmr.msra.gmra.mrb[28].mxu0 %vm567_vm5, %v1137_v44 }
 0x186   :  { %2038 = vmatpush3.bf16.msra.mxu0 %v1293_v60  ;;  %2039 = vmatprep.mubr.msk.bf16.mxu0 %vm2214_vm2, %v2213_v23 }
 0x187   :  { %2049 = vmatprep.subr.bf16.mxu0 %v2213_v23 }
 0x18d   :  { %2040 = vmatmul.mubr.msk.bf16.vlgmr.msra.gmra.mrb[32].mxu0 %vm567_vm5, %v1281_v45 }
 0x18e   :  { %2050 = vmatpush3.bf16.msra.mxu0 %v1437_v62  ;;  %2051 = vmatprep.mubr.msk.bf16.mxu0 %vm2214_vm2, %v2213_v23 }
 0x18f   :  { %2061 = vmatprep.subr.bf16.mxu0 %v2213_v23 }
 0x195   :  { %2052 = vmatmul.mubr.msk.bf16.vlgmr.msra.gmra.mrb[36].mxu0 %vm567_vm5, %v1425_v51 }
 0x196   :  { %2062 = vmatpush3.bf16.msra.mxu0 %v1581_v0  ;;  %2063 = vmatprep.mubr.msk.bf16.mxu0 %vm2214_vm2, %v2213_v23 }
 0x197   :  { %2073 = vmatprep.subr.bf16.mxu0 %v2213_v23 }
 0x19d   :  { %2064 = vmatmul.mubr.msk.bf16.vlgmr.msra.gmra.mrb[40].mxu0 %vm567_vm5, %v1569_v53 }
 0x19e   :  { %2077 = vmatprep.mubr.msk.bf16.mxu0 %vm2214_vm2, %v2213_v23 }
 0x1b9   :  { %v2498_v59 = vpop.f32.mrb[8].mxu1 }
 0x1ba   :  { %v2500_v60 = vpop.f32.mrb[9].mxu1 }
 0x221   :  { %v2416_v3 = vpop.f32.mrb[12].mxu0 }
 0x222   :  { %v1981_v4 = vpop.f32.mrb[13].mxu0  ;;  %v617_v5 = vsel %vm616_vm6, %v2416_v3, -inf }
 0x223   :  { %618 = vmax.xlane.f32.xlu1 %v617_v5  ;;  %v2420_v6 = vpop.f32.mrb[14].mxu0 }
 0x224   :  { %v620_v7 = vsel %vm616_vm6, %v2420_v6, -inf  ;;  %v1982_v8 = vpop.f32.mrb[15].mxu0 }
 0x225   :  { %621 = vmax.xlane.f32.xlu0 %v620_v7 }
 0x229   :  { %v2424_v9 = vpop.f32.mrb[16].mxu0 }
 0x22a   :  { %v760_v10 = vsel %vm616_vm6, %v2424_v9, -inf  ;;  %v1993_v11 = vpop.f32.mrb[17].mxu0 }
 0x22b   :  { %761 = vmax.xlane.f32.xlu1 %v760_v10  ;;  %v2428_v12 = vpop.f32.mrb[18].mxu0 }
 0x22c   :  { %v763_v13 = vsel %vm616_vm6, %v2428_v12, -inf  ;;  %v1994_v14 = vpop.f32.mrb[19].mxu0 }
 0x22f   :  { %764 = vmax.xlane.f32.xlu1 %v763_v13 }
 0x248   :  { %v2432_v15 = vpop.f32.mrb[20].mxu0 }
 0x249   :  { %v2005_v16 = vpop.f32.mrb[21].mxu0  ;;  %v904_v17 = vsel %vm616_vm6, %v2432_v15, -inf }
 0x24a   :  { %905 = vmax.xlane.f32.xlu1 %v904_v17  ;;  %v2436_v18 = vpop.f32.mrb[22].mxu0 }
 0x24b   :  { %v2006_v19 = vpop.f32.mrb[23].mxu0  ;;  %v907_v20 = vsel %vm616_vm6, %v2436_v18, -inf }
 0x24c   :  { %908 = vmax.xlane.f32.xlu0 %v907_v20 }
 0x250   :  { %v2440_v21 = vpop.f32.mrb[24].mxu0 }
 0x251   :  { %v2017_v24 = vpop.f32.mrb[25].mxu0  ;;  %v1048_v48 = vsel %vm616_vm6, %v2440_v21, -inf }
 0x252   :  { %v2442_v25 = vpop.f32.mrb[26].mxu0 }
 0x253   :  { %v2018_v26 = vpop.f32.mrb[27].mxu0  ;;  %v1051_v49 = vsel %vm616_vm6, %v2442_v25, -inf }
 0x258   :  { %v2449_v28 = vpop.f32.mrb[28].mxu0 }
 0x259   :  { %v2029_v29 = vpop.f32.mrb[29].mxu0  ;;  %v1192_v50 = vsel %vm616_vm6, %v2449_v28, -inf }
 0x25a   :  { %v2451_v30 = vpop.f32.mrb[30].mxu0 }
 0x25b   :  { %107 = vperm.xlu1 %2101, %v2447_v27   ;;  %v2030_v31 = vpop.f32.mrb[31].mxu0  ;;  %v1195_v51 = vsel %vm616_vm6, %v2451_v30, -inf }
 0x260   :  { %v2459_v22 = vpop.f32.mrb[32].mxu0 }
 0x261   :  { %v2041_v37 = vpop.f32.mrb[33].mxu0  ;;  %v1336_v52 = vsel %vm616_vm6, %v2459_v22, -inf }
 0x262   :  { %102 = vperm.xlu0 %2100, %v2457_v34   ;;  %v2462_v38 = vpop.f32.mrb[34].mxu0 }
 0x263   :  { %v2042_v39 = vpop.f32.mrb[35].mxu0  ;;  %v1339_v53 = vsel %vm616_vm6, %v2462_v38, -inf }
 0x268   :  { %v2464_v40 = vpop.f32.mrb[36].mxu0 }
 0x269   :  { %v2053_v41 = vpop.f32.mrb[37].mxu0  ;;  %v1480_v54 = vsel %vm616_vm6, %v2464_v40, -inf }
 0x26a   :  { %v2466_v42 = vpop.f32.mrb[38].mxu0 }
 0x26b   :  { %v2054_v43 = vpop.f32.mrb[39].mxu0  ;;  %v1483_v55 = vsel %vm616_vm6, %v2466_v42, -inf }
 0x270   :  { %v2468_v44 = vpop.f32.mrb[40].mxu0 }
 0x271   :  { %v2065_v45 = vpop.f32.mrb[41].mxu0  ;;  %v1624_v56 = vsel %vm616_vm6, %v2468_v44, -inf }
 0x272   :  { %v2470_v46 = vpop.f32.mrb[42].mxu0 }
 0x273   :  { %v2066_v47 = vpop.f32.mrb[43].mxu0  ;;  %v1627_v57 = vsel %vm616_vm6, %v2470_v46, -inf }
 0x27f   :  { %1049 = vmax.xlane.f32.xlu1 %v1048_v48 }
 0x281   :  { %1052 = vmax.xlane.f32.xlu0 %v1051_v49 }
 0x283   :  { %1193 = vmax.xlane.f32.xlu1 %v1192_v50 }
 0x285   :  { %1196 = vmax.xlane.f32.xlu0 %v1195_v51 }
 0x287   :  { %1337 = vmax.xlane.f32.xlu1 %v1336_v52 }
 0x289   :  { %1340 = vmax.xlane.f32.xlu0 %v1339_v53 }
 0x28b   :  { %1481 = vmax.xlane.f32.xlu1 %v1480_v54 }
 0x28d   :  { %1484 = vmax.xlane.f32.xlu0 %v1483_v55 }
 0x28f   :  { %1625 = vmax.xlane.f32.xlu1 %v1624_v56 }
 0x291   :  { %1628 = vmax.xlane.f32.xlu0 %v1627_v57 }
 0x2a0   :  { %112 = vperm.xlu1 %2101, %v2495_v58  }
 0x2a7   :  { %357 = vperm.xlu0 %2100, %v2356_v32  }
 0x2b0   :  { %v619_v61 = vpop.xlane.xlu1 %618 }
 0x2b1   :  { %v623_v63 = vsub.f32 %v2416_v3, %v619_v61 }
 0x2b2   :  { %v622_v62 = vpop.xlane.xlu0 %621 }
 0x2b3   :  { %v624_v0 = vsub.f32 %v2420_v6, %v622_v62 }
 0x2b5   :  { %v625_v1 = vpack.c.bf16 %v624_v0, %v623_v63 }
 0x2b7   :  { %v627_v2 = vmul.bf16 1069105081, %v625_v1 }
 0x2b8   :  { %v762_v4 = vpop.xlane.xlu1 %761 }
 0x2b9   :  { %2116 = vpow.bf16 %v627_v2  ;;  %v766_v7 = vsub.f32 %v2424_v9, %v762_v4 }
 0x2bc   :  { %v765_v5 = vpop.xlane.xlu1 %764 }
 0x2bd   :  { %v767_v8 = vsub.f32 %v2428_v12, %v765_v5 }
 0x2bf   :  { %v768_v10 = vpack.c.bf16 %v767_v8, %v766_v7 }
 0x2c1   :  { %v770_v11 = vmul.bf16 1069105081, %v768_v10 }
 0x2c3   :  { %2118 = vpow.bf16 %v770_v11 }
 0x2c4   :  { %v2507_v13 = vpop.eup %2116 }
 0x2c5   :  { %v630_v32 = vunpack.c.h.bf16 %v2507_v13  ;;  %v629_v3 = vunpack.c.l.bf16 %v2507_v13  ;;  %v550_v13 = vld [vmem:[#allocation4] sm:$0xf] }
 0x2c7   :  { %v634_v6 = vsel %vm616_vm6, %v630_v32, 0.0  ;;  %v631_v14 = vsel %vm616_vm6, %v629_v3, 0.0 }
 0x2c8   :  { %635 = vadd.xlane.f32.xlu0 %v634_v6  ;;  %632 = vadd.xlane.f32.xlu1 %v631_v14 }
 0x2ce   :  { %v2517_v9 = vpop.eup %2118 }
 0x2cf   :  { %v773_v12 = vunpack.c.h.bf16 %v2517_v9  ;;  %v772_v16 = vunpack.c.l.bf16 %v2517_v9 }
 0x2d1   :  { %v777_v17 = vsel %vm616_vm6, %v773_v12, 0.0  ;;  %v774_v19 = vsel %vm616_vm6, %v772_v16, 0.0 }
 0x2d2   :  { %778 = vadd.xlane.f32.xlu0 %v777_v17  ;;  %775 = vadd.xlane.f32.xlu1 %v774_v19 }
 0x2d7   :  { %v906_v20 = vpop.xlane.xlu1 %905 }
 0x2d8   :  { %v910_v26 = vsub.f32 %v2432_v15, %v906_v20 }
 0x2d9   :  { %v909_v24 = vpop.xlane.xlu0 %908 }
 0x2da   :  { %v911_v29 = vsub.f32 %v2436_v18, %v909_v24 }
 0x2db   :  { %v108_v31 = vpop.permute.xlu1 %107 }
 0x2dc   :  { %v912_v37 = vpack.c.bf16 %v911_v29, %v910_v26  ;;  %v248_v39 = vadd.f32 %v2358_v33, %v108_v31 }
 0x2de   :  { %v914_v41 = vmul.bf16 1069105081, %v912_v37  ;;  %v282_v43 = vpack.c.bf16 %v248_v39, %v248_v39 }
 0x2e0   :  { %2120 = vpow.bf16 %v914_v41  ;;  %284 = vst.msk [vmem:[#allocation4 + $0x8] sm:$0xf] %vm255_vm3, %v282_v43 }
 0x2e1   :  { %v103_v45 = vpop.permute.xlu0 %102 }
 0x2e2   :  { %v243_v47 = vadd.f32 %v2363_v36, %v103_v45  ;;  %v2543_v36 = vpop.f32.mrb[10].mxu1 }
 0x2e3   :  { %v2545_v51 = vpop.f32.mrb[11].mxu1 }
 0x2e4   :  { %v279_v48 = vpack.c.bf16 %v243_v47, %v243_v47 }
 0x2e6   :  { %281 = vst.msk [vmem:[#allocation4 + $0x4] sm:$0xf] %vm255_vm3, %v279_v48 }
 0x2eb   :  { %v2533_v49 = vpop.eup %2120 }
 0x2ec   :  { %v917_v15 = vunpack.c.h.bf16 %v2533_v49  ;;  %v916_v18 = vunpack.c.l.bf16 %v2533_v49 }
 0x2ee   :  { %v921_v33 = vsel %vm616_vm6, %v917_v15, 0.0  ;;  %v918_v50 = vsel %vm616_vm6, %v916_v18, 0.0 }
 0x2ef   :  { %922 = vadd.xlane.f32.xlu0 %v921_v33  ;;  %919 = vadd.xlane.f32.xlu1 %v918_v50 }
 0x300   :  { %362 = vperm.xlu1 %2101, %v2457_v34  }
 0x30c   :  { %v1050_v52 = vpop.xlane.xlu1 %1049 }
 0x30d   :  { %v1054_v54 = vsub.f32 %v2440_v21, %v1050_v52 }
 0x30e   :  { %v1053_v53 = vpop.xlane.xlu0 %1052 }
 0x30f   :  { %v1055_v55 = vsub.f32 %v2442_v25, %v1053_v53 }
 0x310   :  { %v1194_v56 = vpop.xlane.xlu1 %1193 }
 0x311   :  { %v1056_v57 = vpack.c.bf16 %v1055_v55, %v1054_v54  ;;  %v1198_v63 = vsub.f32 %v2449_v28, %v1194_v56 }
 0x312   :  { %v1197_v61 = vpop.xlane.xlu0 %1196 }
 0x313   :  { %v1058_v62 = vmul.bf16 1069105081, %v1056_v57  ;;  %v1199_v0 = vsub.f32 %v2451_v30, %v1197_v61 }
 0x314   :  { %v1338_v1 = vpop.xlane.xlu1 %1337 }
 0x315   :  { %2122 = vpow.bf16 %v1058_v62  ;;  %v1200_v2 = vpack.c.bf16 %v1199_v0, %v1198_v63  ;;  %v1342_v34 = vsub.f32 %v2459_v22, %v1338_v1 }
 0x316   :  { %v1341_v4 = vpop.xlane.xlu0 %1340 }
 0x317   :  { %v1202_v5 = vmul.bf16 1069105081, %v1200_v2  ;;  %v1343_v7 = vsub.f32 %v2462_v38, %v1341_v4  ;;  %v1709_v4 = vld [vmem:[%s2762_s4] sm:$0xf] }
 0x318   :  { %v1482_v21 = vpop.xlane.xlu1 %1481 }
 0x319   :  { %2124 = vpow.bf16 %v1202_v5  ;;  %v1344_v25 = vpack.c.bf16 %v1343_v7, %v1342_v34  ;;  %v1486_v11 = vsub.f32 %v2464_v40, %v1482_v21  ;;  %v1768_v5 = vld [vmem:[%s2762_s4] sm:$0xf] }
 0x31a   :  { %v1485_v8 = vpop.xlane.xlu0 %1484 }
 0x31b   :  { %v1346_v10 = vmul.bf16 1069105081, %v1344_v25  ;;  %v1487_v28 = vsub.f32 %v2466_v42, %v1485_v8 }
 0x31c   :  { %v1626_v6 = vpop.xlane.xlu1 %1625 }
 0x31d   :  { %2126 = vpow.bf16 %v1346_v10  ;;  %v1488_v30 = vpack.c.bf16 %v1487_v28, %v1486_v11  ;;  %v1630_v19 = vsub.f32 %v2468_v44, %v1626_v6 }
 0x31e   :  { %v1629_v14 = vpop.xlane.xlu0 %1628 }
 0x31f   :  { %v1490_v17 = vmul.bf16 1069105081, %v1488_v30  ;;  %v1631_v22 = vsub.f32 %v2470_v46, %v1629_v14 }
 0x320   :  { %v2558_v20 = vpop.eup %2122  ;;  %v113_v38 = vpop.permute.xlu1 %112 }
 0x321   :  { %2128 = vpow.bf16 %v1490_v17  ;;  %v1632_v24 = vpack.c.bf16 %v1631_v22, %v1630_v19  ;;  %v251_v26 = vadd.f32 %v2361_v35, %v113_v38  ;;  %v1060_v40 = vunpack.c.l.bf16 %v2558_v20 }
 0x322   :  { %v1061_v37 = vunpack.c.h.bf16 %v2558_v20 }
 0x323   :  { %v1634_v29 = vmul.bf16 1069105081, %v1632_v24  ;;  %v285_v42 = vpack.c.bf16 %v251_v26, %v251_v26  ;;  %v1062_v31 = vsel %vm616_vm6, %v1060_v40, 0.0 }
 0x324   :  { %v2566_v44 = vpop.eup %2124  ;;  %1063 = vadd.xlane.f32.xlu0 %v1062_v31  ;;  %v1065_v41 = vsel %vm616_vm6, %v1061_v37, 0.0 }
 0x325   :  { %2130 = vpow.bf16 %v1634_v29  ;;  %287 = vst.msk [vmem:[#allocation4 + $0xc] sm:$0xf] %vm255_vm3, %v285_v42  ;;  %v1204_v46 = vunpack.c.l.bf16 %v2566_v44  ;;  %v1205_v45 = vunpack.c.h.bf16 %v2566_v44 }
 0x326   :  { %v358_v39 = vpop.permute.xlu0 %357 }
 0x327   :  { %v498_v35 = vadd.f32 %v2500_v60, %v358_v39  ;;  %v1206_v43 = vsel %vm616_vm6, %v1204_v46, 0.0  ;;  %v1209_v60 = vsel %vm616_vm6, %v1205_v45, 0.0 }
 0x328   :  { %v2578_v47 = vpop.eup %2126  ;;  %1066 = vadd.xlane.f32.xlu0 %v1065_v41  ;;  %1207 = vadd.xlane.f32.xlu1 %v1206_v43 }
 0x329   :  { %v536_v48 = vpack.c.bf16 %v498_v35, %v498_v35  ;;  %v1348_v33 = vunpack.c.l.bf16 %v2578_v47  ;;  %v1349_v55 = vunpack.c.h.bf16 %v2578_v47 }
 0x32b   :  { %538 = vst.msk [vmem:[#allocation4 + $0x10] sm:$0xf] %vm255_vm3, %v536_v48  ;;  %v1350_v53 = vsel %vm616_vm6, %v1348_v33, 0.0  ;;  %v1353_v61 = vsel %vm616_vm6, %v1349_v55, 0.0 }
 0x32c   :  { %v2585_v50 = vpop.eup %2128  ;;  %1210 = vadd.xlane.f32.xlu0 %v1209_v60 }
 0x32d   :  { %v1493_v52 = vunpack.c.h.bf16 %v2585_v50  ;;  %v1492_v63 = vunpack.c.l.bf16 %v2585_v50 }
 0x32f   :  { %v1497_v54 = vsel %vm616_vm6, %v1493_v52, 0.0  ;;  %v1494_v0 = vsel %vm616_vm6, %v1492_v63, 0.0 }
 0x330   :  { %v2595_v56 = vpop.eup %2130  ;;  %1351 = vadd.xlane.f32.xlu0 %v1350_v53  ;;  %1498 = vadd.xlane.f32.xlu1 %v1497_v54 }
 0x331   :  { %v1637_v57 = vunpack.c.h.bf16 %v2595_v56  ;;  %v1636_v1 = vunpack.c.l.bf16 %v2595_v56 }
 0x333   :  { %v1641_v62 = vsel %vm616_vm6, %v1637_v57, 0.0  ;;  %v1638_v2 = vsel %vm616_vm6, %v1636_v1, 0.0 }
 0x334   :  { %1354 = vadd.xlane.f32.xlu0 %v1353_v61  ;;  %1642 = vadd.xlane.f32.xlu1 %v1641_v62 }
 0x338   :  { %1495 = vadd.xlane.f32.xlu0 %v1494_v0 }
 0x33c   :  { %1639 = vadd.xlane.f32.xlu0 %v1638_v2 }
 0x345   :  { %372 = vperm.xlu1 %2101, %v2495_v58  }
 0x349   :  { %1712 = vperm.xlu1 %2101, %v1709_v4  }
 0x34d   :  { %1771 = vperm.xlu1 %2101, %v1768_v5  }
 0x352   :  { %367 = vperm.xlu0 %2100, %v2447_v27  }
 0x355   :  { %v633_v34 = vpop.xlane.xlu1 %632  ;;  %v636_v7 = vpop.xlane.xlu0 %635 }
 0x356   :  { %2132 = vrcp.f32 %v633_v34 }
 0x357   :  { %2134 = vrcp.f32 %v636_v7 }
 0x35f   :  { %v776_v21 = vpop.xlane.xlu1 %775  ;;  %v779_v25 = vpop.xlane.xlu0 %778 }
 0x360   :  { %v2133_v8 = vpop.eup %2132  ;;  %2136 = vrcp.f32 %v776_v21 }
 0x361   :  { %v2135_v58 = vpop.eup %2134  ;;  %2138 = vrcp.f32 %v779_v25  ;;  %v639_v10 = vmul.f32 %v2133_v8, %v629_v3 }
 0x362   :  { %v640_v11 = vmul.f32 %v2135_v58, %v630_v32 }
 0x363   :  { %641 = vst.msk [vmem:[#allocation8] sm:$0xff] %vm616_vm6, %v639_v10 }
 0x364   :  { %642 = vst.msk [vmem:[#allocation8 + $0x8] sm:$0xff] %vm616_vm6, %v640_v11  ;;  %v643_v27 = vpack.c.bf16 %v640_v11, %v639_v10  ;;  %v984_v11 = vld [vmem:[#allocation4 + $0xc] sm:$0xf] }
 0x366   :  { %v648_v28 = vsel %vm616_vm6, %v643_v27, 0 }
 0x367   :  { %1984 = vmatpush3.bf16.xpose.msra.mxu1 %v648_v28 }
 0x368   :  { %1995 = vmatprep.subr.bf16.mxu1 %v2213_v23 }
 0x36a   :  { %v2137_v6 = vpop.eup %2136 }
 0x36b   :  { %v2139_v30 = vpop.eup %2138  ;;  %v782_v14 = vmul.f32 %v2137_v6, %v772_v16  ;;  %v696_v16 = vld [vmem:[#allocation4 + $0x4] sm:$0xf] }
 0x36c   :  { %v783_v3 = vmul.f32 %v2139_v30, %v773_v12 }
 0x36d   :  { %785 = vst.msk [vmem:[#allocation8 + $0x10] sm:$0xff] %vm616_vm6, %v782_v14 }
 0x36e   :  { %1986 = vmatmul.mubr.msk.bf16.vlgmr.msra.gmra.mrb[12].mxu1 %vm616_vm6, %v550_v13  ;;  %786 = vst.msk [vmem:[#allocation8 + $0x18] sm:$0xff] %vm616_vm6, %v783_v3  ;;  %v787_v32 = vpack.c.bf16 %v783_v3, %v782_v14  ;;  %v1128_v3 = vld [vmem:[#allocation4 + $0x10] sm:$0xf] }
 0x36f   :  { %1997 = vmatprep.mubr.msk.bf16.mxu1 %vm2214_vm2, %v2213_v23 }
 0x370   :  { %v792_v17 = vsel %vm616_vm6, %v787_v32, 0 }
 0x371   :  { %1996 = vmatpush3.bf16.xpose.msra.mxu1 %v792_v17 }
 0x372   :  { %2007 = vmatprep.subr.bf16.mxu1 %v2213_v23 }
 0x378   :  { %1998 = vmatmul.mubr.msk.bf16.vlgmr.msra.gmra.mrb[16].mxu1 %vm616_vm6, %v696_v16 }
 0x379   :  { %2009 = vmatprep.mubr.msk.bf16.mxu1 %vm2214_vm2, %v2213_v23 }
 0x37c   :  { %v920_v9 = vpop.xlane.xlu1 %919  ;;  %v923_v12 = vpop.xlane.xlu0 %922 }
 0x37d   :  { %2140 = vrcp.f32 %v920_v9 }
 0x37e   :  { %2142 = vrcp.f32 %v923_v12 }
 0x380   :  { %v363_v19 = vpop.permute.xlu1 %362 }
 0x381   :  { %v501_v22 = vadd.f32 %v2545_v51, %v363_v19  ;;  %v840_v51 = vld [vmem:[#allocation4 + $0x8] sm:$0xf] }
 0x383   :  { %v539_v38 = vpack.c.bf16 %v501_v22, %v501_v22 }
 0x385   :  { %541 = vst.msk [vmem:[#allocation4 + $0x14] sm:$0xf] %vm255_vm3, %v539_v38 }
 0x387   :  { %v2141_v24 = vpop.eup %2140 }
 0x388   :  { %v2143_v26 = vpop.eup %2142  ;;  %v926_v29 = vmul.f32 %v2141_v24, %v916_v18 }
 0x389   :  { %v927_v42 = vmul.f32 %v2143_v26, %v917_v15 }
 0x38a   :  { %929 = vst.msk [vmem:[#allocation8 + $0x20] sm:$0xff] %vm616_vm6, %v926_v29 }
 0x38b   :  { %930 = vst.msk [vmem:[#allocation8 + $0x28] sm:$0xff] %vm616_vm6, %v927_v42  ;;  %v931_v31 = vpack.c.bf16 %v927_v42, %v926_v29 }
 0x38c   :  { %v1272_v50 = vld [vmem:[#allocation4 + $0x14] sm:$0xf] }
 0x38d   :  { %v936_v39 = vsel %vm616_vm6, %v931_v31, 0 }
 0x38e   :  { %2008 = vmatpush3.bf16.xpose.msra.mxu1 %v936_v39 }
 0x38f   :  { %2019 = vmatprep.subr.bf16.mxu1 %v2213_v23 }
 0x395   :  { %2010 = vmatmul.mubr.msk.bf16.vlgmr.msra.gmra.mrb[20].mxu1 %vm616_vm6, %v840_v51 }
 0x396   :  { %2021 = vmatprep.mubr.msk.bf16.mxu1 %vm2214_vm2, %v2213_v23 }
 0x3b1   :  { %v1064_v18 = vpop.xlane.xlu0 %1063 }
 0x3b2   :  { %2144 = vrcp.f32 %v1064_v18 }
 0x3b5   :  { %v1208_v49 = vpop.xlane.xlu1 %1207  ;;  %v1067_v15 = vpop.xlane.xlu0 %1066 }
 0x3b6   :  { %2146 = vrcp.f32 %v1208_v49 }
 0x3b7   :  { %2148 = vrcp.f32 %v1067_v15 }
 0x3b9   :  { %v1211_v35 = vpop.xlane.xlu0 %1210 }
 0x3ba   :  { %2150 = vrcp.f32 %v1211_v35 }
 0x3bc   :  { %v2145_v41 = vpop.eup %2144 }
 0x3bd   :  { %v1499_v43 = vpop.xlane.xlu1 %1498  ;;  %v1352_v48 = vpop.xlane.xlu0 %1351  ;;  %v1070_v60 = vmul.f32 %v2145_v41, %v1060_v40 }
 0x3be   :  { %2152 = vrcp.f32 %v1499_v43 }
 0x3bf   :  { %2154 = vrcp.f32 %v1352_v48  ;;  %1073 = vst.msk [vmem:[#allocation8 + $0x30] sm:$0xff] %vm616_vm6, %v1070_v60 }
 0x3c0   :  { %v2147_v53 = vpop.eup %2146 }
 0x3c1   :  { %v2149_v54 = vpop.eup %2148  ;;  %v1643_v61 = vpop.xlane.xlu1 %1642  ;;  %v1214_v0 = vmul.f32 %v2147_v53, %v1204_v46 }
 0x3c2   :  { %v1355_v62 = vpop.xlane.xlu0 %1354  ;;  %2156 = vrcp.f32 %v1643_v61  ;;  %v1071_v2 = vmul.f32 %v2149_v54, %v1061_v37 }
 0x3c3   :  { %2158 = vrcp.f32 %v1355_v62  ;;  %1217 = vst.msk [vmem:[#allocation8 + $0x40] sm:$0xff] %vm616_vm6, %v1214_v0 }
 0x3c4   :  { %v2151_v4 = vpop.eup %2150  ;;  %1074 = vst.msk [vmem:[#allocation8 + $0x38] sm:$0xff] %vm616_vm6, %v1071_v2  ;;  %v1075_v40 = vpack.c.bf16 %v1071_v2, %v1070_v60 }
 0x3c5   :  { %v373_v5 = vpop.permute.xlu1 %372  ;;  %v1215_v7 = vmul.f32 %v2151_v4, %v1205_v45  ;;  %v1708_v4 = vld [vmem:[%s2761_s3] sm:$0x3] }
 0x3c6   :  { %v1496_v34 = vpop.xlane.xlu0 %1495  ;;  %v509_v21 = vadd.f32 %v2543_v36, %v373_v5  ;;  %v1080_v46 = vsel %vm616_vm6, %v1075_v40, 0 }
 0x3c7   :  { %2160 = vrcp.f32 %v1496_v34  ;;  %2020 = vmatpush3.bf16.xpose.msra.mxu1 %v1080_v46  ;;  %1218 = vst.msk [vmem:[#allocation8 + $0x48] sm:$0xff] %vm616_vm6, %v1215_v7  ;;  %v1219_v44 = vpack.c.bf16 %v1215_v7, %v1214_v0 }
 0x3c8   :  { %v2153_v20 = vpop.eup %2152  ;;  %v545_v37 = vpack.c.bf16 %v509_v21, %v509_v21  ;;  %2031 = vmatprep.subr.bf16.mxu1 %v2213_v23 }
 0x3c9   :  { %v2155_v25 = vpop.eup %2154  ;;  %v1503_v58 = vmul.f32 %v2153_v20, %v1493_v52  ;;  %v1224_v52 = vsel %vm616_vm6, %v1219_v44, 0 }
 0x3ca   :  { %v1640_v8 = vpop.xlane.xlu0 %1639  ;;  %547 = vst.msk [vmem:[#allocation4 + $0x1c] sm:$0xf] %vm255_vm3, %v545_v37  ;;  %v1358_v36 = vmul.f32 %v2155_v25, %v1348_v33 }
 0x3cb   :  { %2162 = vrcp.f32 %v1640_v8  ;;  %1506 = vst.msk [vmem:[#allocation8 + $0x68] sm:$0xff] %vm616_vm6, %v1503_v58 }
 0x3cc   :  { %v2157_v45 = vpop.eup %2156  ;;  %1361 = vst.msk [vmem:[#allocation8 + $0x50] sm:$0xff] %vm616_vm6, %v1358_v36 }
 0x3cd   :  { %v2159_v10 = vpop.eup %2158  ;;  %v1647_v27 = vmul.f32 %v2157_v45, %v1637_v57 }
 0x3ce   :  { %2022 = vmatmul.mubr.msk.bf16.vlgmr.msra.gmra.mrb[24].mxu1 %vm616_vm6, %v984_v11  ;;  %v1359_v28 = vmul.f32 %v2159_v10, %v1349_v55 }
 0x3cf   :  { %2032 = vmatpush3.bf16.xpose.msra.mxu1 %v1224_v52  ;;  %2033 = vmatprep.mubr.msk.bf16.mxu1 %vm2214_vm2, %v2213_v23  ;;  %1650 = vst.msk [vmem:[#allocation8 + $0x78] sm:$0xff] %vm616_vm6, %v1647_v27 }
 0x3d0   :  { %2043 = vmatprep.subr.bf16.mxu1 %v2213_v23  ;;  %1362 = vst.msk [vmem:[#allocation8 + $0x58] sm:$0xff] %vm616_vm6, %v1359_v28  ;;  %v1363_v14 = vpack.c.bf16 %v1359_v28, %v1358_v36  ;;  %v1767_v28 = vld [vmem:[%s2761_s3] sm:$0x3] }
 0x3d1   :  { %v2161_v33 = vpop.eup %2160  ;;  %v368_v6 = vpop.permute.xlu0 %367  ;;  %v1560_v16 = vld [vmem:[#allocation4 + $0x1c] sm:$0xf] }
 0x3d2   :  { %v1502_v57 = vmul.f32 %v2161_v33, %v1492_v63  ;;  %v506_v30 = vadd.f32 %v2498_v59, %v368_v6  ;;  %v1368_v32 = vsel %vm616_vm6, %v1363_v14, 0 }
 0x3d4   :  { %1505 = vst.msk [vmem:[#allocation8 + $0x60] sm:$0xff] %vm616_vm6, %v1502_v57  ;;  %v542_v55 = vpack.c.bf16 %v506_v30, %v506_v30  ;;  %v1507_v59 = vpack.c.bf16 %v1503_v58, %v1502_v57 }
 0x3d5   :  { %v2163_v47 = vpop.eup %2162 }
 0x3d6   :  { %v1646_v13 = vmul.f32 %v2163_v47, %v1636_v1  ;;  %544 = vst.msk [vmem:[#allocation4 + $0x18] sm:$0xf] %vm255_vm3, %v542_v55  ;;  %2034 = vmatmul.mubr.msk.bf16.vlgmr.msra.gmra.mrb[28].mxu1 %vm616_vm6, %v1128_v3  ;;  %v1512_v56 = vsel %vm616_vm6, %v1507_v59, 0 }
 0x3d7   :  { %2044 = vmatpush3.bf16.xpose.msra.mxu1 %v1368_v32  ;;  %2045 = vmatprep.mubr.msk.bf16.mxu1 %vm2214_vm2, %v2213_v23 }
 0x3d8   :  { %1649 = vst.msk [vmem:[#allocation8 + $0x70] sm:$0xff] %vm616_vm6, %v1646_v13  ;;  %2055 = vmatprep.subr.bf16.mxu1 %v2213_v23  ;;  %v1651_v63 = vpack.c.bf16 %v1647_v27, %v1646_v13 }
 0x3da   :  { %v1656_v17 = vsel %vm616_vm6, %v1651_v63, 0 }
 0x3dd   :  { %v1416_v1 = vld [vmem:[#allocation4 + $0x18] sm:$0xf] }
 0x3de   :  { %2046 = vmatmul.mubr.msk.bf16.vlgmr.msra.gmra.mrb[32].mxu1 %vm616_vm6, %v1272_v50 }
 0x3df   :  { %2056 = vmatpush3.bf16.xpose.msra.mxu1 %v1512_v56  ;;  %2057 = vmatprep.mubr.msk.bf16.mxu1 %vm2214_vm2, %v2213_v23 }
 0x3e0   :  { %2067 = vmatprep.subr.bf16.mxu1 %v2213_v23 }
 0x3e6   :  { %2058 = vmatmul.mubr.msk.bf16.vlgmr.msra.gmra.mrb[36].mxu1 %vm616_vm6, %v1416_v1 }
 0x3e7   :  { %2068 = vmatpush3.bf16.xpose.msra.mxu1 %v1656_v17  ;;  %2069 = vmatprep.mubr.msk.bf16.mxu1 %vm2214_vm2, %v2213_v23 }
 0x3e8   :  { %2081 = vmatprep.subr.bf16.mxu1 %v2213_v23 }
 0x3ee   :  { %2070 = vmatmul.mubr.msk.bf16.vlgmr.msra.gmra.mrb[40].mxu1 %vm616_vm6, %v1560_v16 }
 0x3ef   :  { %2085 = vmatprep.mubr.msk.bf16.mxu1 %vm2214_vm2, %v2213_v23 }
 0x441   :  { %v684_v9 = vpop.f32.mrb[12].mxu1 }
 0x442   :  { %690 = vst.msk [vmem:[#allocation5] sm:$0xff] %vm616_vm6, %v684_v9  ;;  %v1987_v12 = vpop.f32.mrb[13].mxu1 }
 0x443   :  { %v687_v19 = vpop.f32.mrb[14].mxu1 }
 0x444   :  { %v1988_v22 = vpop.f32.mrb[15].mxu1 }
 0x449   :  { %v1702_v42 = vld [vmem:[#allocation5] sm:$0xff] }
 0x44b   :  { %v828_v38 = vpop.f32.mrb[16].mxu1 }
 0x44c   :  { %834 = vst.msk [vmem:[#allocation5 + $0x8] sm:$0xff] %vm616_vm6, %v828_v38  ;;  %v1999_v24 = vpop.f32.mrb[17].mxu1 }
 0x44d   :  { %v831_v26 = vpop.f32.mrb[18].mxu1 }
 0x44e   :  { %v2000_v29 = vpop.f32.mrb[19].mxu1 }
 0x453   :  { %v1703_v31 = vld [vmem:[#allocation5 + $0x8] sm:$0xff] }
 0x454   :  { %v1706_v39 = vpack.c.bf16 %v1703_v31, %v1702_v42 }
 0x456   :  { %2074 = vmatpush3.bf16.msra.mxu0 %v1706_v39 }
 0x457   :  { %2075 = vmatprep.subr.bf16.mxu0 %v2213_v23 }
 0x468   :  { %v972_v51 = vpop.f32.mrb[20].mxu1 }
 0x469   :  { %978 = vst.msk [vmem:[#allocation5 + $0x10] sm:$0xff] %vm616_vm6, %v972_v51  ;;  %v2011_v18 = vpop.f32.mrb[21].mxu1 }
 0x46a   :  { %v975_v49 = vpop.f32.mrb[22].mxu1 }
 0x46b   :  { %v2012_v15 = vpop.f32.mrb[23].mxu1 }
 0x470   :  { %v1704_v53 = vld [vmem:[#allocation5 + $0x10] sm:$0xff] }
 0x4a1   :  { %v1116_v35 = vpop.f32.mrb[24].mxu1 }
 0x4a2   :  { %1122 = vst.msk [vmem:[#allocation5 + $0x18] sm:$0xff] %vm616_vm6, %v1116_v35  ;;  %v2023_v41 = vpop.f32.mrb[25].mxu1 }
 0x4a3   :  { %v1119_v43 = vpop.f32.mrb[26].mxu1 }
 0x4a4   :  { %v2024_v48 = vpop.f32.mrb[27].mxu1 }
 0x4a9   :  { %v1260_v60 = vpop.f32.mrb[28].mxu1  ;;  %v1705_v54 = vld [vmem:[#allocation5 + $0x18] sm:$0xff] }
 0x4aa   :  { %1266 = vst.msk [vmem:[#allocation5 + $0x20] sm:$0xff] %vm616_vm6, %v1260_v60  ;;  %v2035_v61 = vpop.f32.mrb[29].mxu1  ;;  %v1707_v62 = vpack.c.bf16 %v1705_v54, %v1704_v53 }
 0x4ab   :  { %v1263_v0 = vpop.f32.mrb[30].mxu1 }
 0x4ac   :  { %v2036_v2 = vpop.f32.mrb[31].mxu1  ;;  %2076 = vmatpush3.bf16.msra.mxu0 %v1707_v62 }
 0x4af   :  { %2078 = vmatmul.mubr.msk.bf16.vlgmr.msra.gmra.mrb[44].mxu0 %vm1715_vm7, %v1708_v4 }
 0x4b1   :  { %v1404_v40 = vpop.f32.mrb[32].mxu1  ;;  %v1761_v46 = vld [vmem:[#allocation5 + $0x20] sm:$0xff] }
 0x4b2   :  { %1410 = vst.msk [vmem:[#allocation5 + $0x28] sm:$0xff] %vm616_vm6, %v1404_v40  ;;  %v2047_v5 = vpop.f32.mrb[33].mxu1 }
 0x4b3   :  { %v1407_v34 = vpop.f32.mrb[34].mxu1 }
 0x4b4   :  { %v2048_v7 = vpop.f32.mrb[35].mxu1 }
 0x4b9   :  { %v1548_v21 = vpop.f32.mrb[36].mxu1  ;;  %v1762_v20 = vld [vmem:[#allocation5 + $0x28] sm:$0xff] }
 0x4ba   :  { %1554 = vst.msk [vmem:[#allocation5 + $0x30] sm:$0xff] %vm616_vm6, %v1548_v21  ;;  %v2059_v37 = vpop.f32.mrb[37].mxu1  ;;  %v1765_v25 = vpack.c.bf16 %v1762_v20, %v1761_v46 }
 0x4bb   :  { %v1551_v8 = vpop.f32.mrb[38].mxu1 }
 0x4bc   :  { %v2060_v58 = vpop.f32.mrb[39].mxu1  ;;  %2082 = vmatpush3.bf16.msra.mxu1 %v1765_v25 }
 0x4bd   :  { %2083 = vmatprep.subr.bf16.mxu1 %v2213_v23 }
 0x4c1   :  { %v1692_v44 = vpop.f32.mrb[40].mxu1  ;;  %v1763_v11 = vld [vmem:[#allocation5 + $0x30] sm:$0xff] }
 0x4c2   :  { %1698 = vst.msk [vmem:[#allocation5 + $0x38] sm:$0xff] %vm616_vm6, %v1692_v44  ;;  %v2071_v36 = vpop.f32.mrb[41].mxu1 }
 0x4c3   :  { %v1695_v45 = vpop.f32.mrb[42].mxu1 }
 0x4c4   :  { %v2072_v10 = vpop.f32.mrb[43].mxu1 }
 0x4c9   :  { %v1764_v27 = vld [vmem:[#allocation5 + $0x38] sm:$0xff] }
 0x4ca   :  { %v1766_v52 = vpack.c.bf16 %v1764_v27, %v1763_v11 }
 0x4cc   :  { %2084 = vmatpush3.bf16.msra.mxu1 %v1766_v52 }
 0x4cf   :  { %2086 = vmatmul.mubr.msk.bf16.vlgmr.msra.gmra.mrb[44].mxu1 %vm1715_vm7, %v1767_v28 }
 0x4d0   :  { %2175 = shalt.err (!%p2172_p4)
}
 0x4d1   :  { %s2176_s8 = scalar_lea.hbm %s2764_s6, 2048 }
 0x4d2   :  { %p2177_p5 = scmp.ne.s32.totalorder %s2764_s6, %s2176_s8  ;;  %p2180_p6 = scmp.lt.u32.totalorder %s2176_s8, %s2764_s6 }
 0x4d4   :  { %p2182_p7 = pnand %p2180_p6, %p2177_p5 }
 0x4d6   :  { %2185 = shalt.err (!%p2182_p7)
}
 0x4d7   :  { %s2216_s12 = smov 128   ;;  %s2217_s13 = smov 8   ;;  %v1713_v23 = vpop.permute.xlu1 %1712 }
 0x4d8   :  { %1842 = dma.vmem_to_hbm [thread:$0]  %s1837_s29, 2048, %s2764_s6, [#allocation9], %s2216_s12, %s2216_s12, %s2217_s13  }
 0x4d9   :  { %s2218_s16 = smov [#allocation6]  }
 0x4da   :  { %s1824_s1 = sshll.u32 %s2218_s16, 4  ;;  %s1825_s1 = int_to_ptr.vmem [resolvable:$true] %s1824_s1 }
 0x4db   :  { %v1772_v47 = vpop.permute.xlu1 %1771  ;;  %s2186_s6 = scalar_lea.vmem %s1825_s1, 128  ;;  %p2191_p9 = scmp.lt.s32.totalorder %s1825_s1, %s1825_s1 }
 0x4dc   :  { %p2187_p8 = scmp.ne.s32.totalorder %s1825_s1, %s2186_s6  ;;  %p2192_p10 = scmp.lt.s32.totalorder %s2186_s6, %s2186_s6 }
 0x4de   :  { %p2193_p11 = por %p2192_p10, %p2191_p9 }
 0x4e0   :  { %p2194_p12 = pnand %p2193_p11, %p2187_p8 }
 0x582   :  { %v1753_v33 = vpop.f32.mrb[44].mxu0 }
 0x583   :  { %v1754_v6 = vadd.f32 %v1753_v33, %v1713_v23  ;;  %v2079_v57 = vpop.f32.mrb[45].mxu0 }
 0x584   :  { %v1756_v30 = vpop.f32.mrb[46].mxu0 }
 0x585   :  { %1760 = vst.msk [vmem:[#allocation6] sm:$0xf] %vm255_vm3, %v1754_v6  ;;  %v2080_v14 = vpop.f32.mrb[47].mxu0 }
 0x5a2   :  { %v1811_v55 = vpop.f32.mrb[44].mxu1 }
 0x5a3   :  { %v1812_v3 = vadd.f32 %v1811_v55, %v1772_v47  ;;  %v2087_v13 = vpop.f32.mrb[45].mxu1 }
 0x5a4   :  { %v1814_v32 = vpop.f32.mrb[46].mxu1 }
 0x5a5   :  { %1818 = vst.msk [vmem:[#allocation6 + $0x4] sm:$0xf] %vm255_vm3, %v1812_v3  ;;  %v2088_v59 = vpop.f32.mrb[47].mxu1 }
 0x5a6   :  { %2197 = shalt.err (!%p2194_p12)
}
 0x5a7   :  { %s2198_s19 = scalar_lea.hbm %s2763_s5, 128 }
 0x5a8   :  { %p2199_p13 = scmp.ne.s32.totalorder %s2763_s5, %s2198_s19  ;;  %p2202_p0 = scmp.lt.u32.totalorder %s2198_s19, %s2763_s5 }
 0x5aa   :  { %p2204_p1 = pnand %p2202_p0, %p2199_p13 }
 0x5ac   :  { %2207 = shalt.err (!%p2204_p1)
}
 0x5ad   :  { %s2219_s23 = smov 64   ;;  %s2220_s24 = smov 4  }
 0x5ae   :  { %1830 = dma.vmem_to_hbm [thread:$0]  %s1825_s1, 128, %s2763_s5, [#allocation7], %s2219_s23, %s2219_s23, %s2220_s24  }
 0x5af   :  { %2208 = dma.done.wait [#allocation7], 128  }
 0x5b0   :  { %2209 = vsyncadd [#allocation7], 4294967168 }
 0x5b1   :  { %2210 = dma.done.wait [#allocation9], 2048  }
 0x5b2   :  { %2211 = vsyncadd [#allocation9], 4294965248 }
 0x5b3   :  { %1849 = vsyncpa [#allocation7], 1 }
 0x5b4   :  { %1850 = vsyncpa [#allocation9], 1 }

</bundles_post_ra>
